<compile_context>
chip_gen: v7x
topology: tpu7x:2x2x1
jax: 0.10.0
libtpu: 0.0.40
codegen_flags: <defaults>
</compile_context>

<pallas_src>
import functools

import jax
import jax.numpy as jnp
from jax.experimental import pallas as pl
from jax.experimental.pallas import tpu as pltpu

# ---- model dimensions (implied by fc1 = Linear(32 * 25, 128)) ---------------
L_IN = 50                    # input sequence length
L_POOL = L_IN // 2           # 25 after MaxPool1d(2, 2)
C1, C2 = 16, 32              # conv channels
F1 = 128                     # fc1 width
NUM_CLASSES = 10
BN_EPS = 1e-5

# ---- lane-aligned (multiple-of-128) padded widths used inside the kernel ----
X_W = 128                    # input x padded 50 -> 128 lanes (zero pad)
H1_HALF = 512                # >= C1*L_POOL = 400 (one maxpool parity half)
H1_W = 2 * H1_HALF           # 1024: conv1 output = [even half | odd half]
H2_W = 896                   # >= C2*L_POOL = 800: conv2 output / fc1 input
OUT_W = 128                  # >= NUM_CLASSES: lane-dense fc2 output
BIAS_W = 1024                # one (4, 1024) bias stack covers all layers


# =============================================================================
# Pallas kernel: 4 bf16 MXU matmuls + f32 bias/ReLU epilogues + one maxpool.
# =============================================================================
def convnet_kernel(x_ref, w1_ref, w2_ref, wf1_ref, wf2_ref, bias_ref, out_ref):
    f32 = jnp.float32
    bf16 = jnp.bfloat16
    b = bias_ref[...]                                          # (4, 1024) f32

    # conv1 + bn1 (folded) + relu1 as a bf16 banded matmul on the MXU.
    xb = x_ref[...].astype(bf16)                               # (TB, 128)
    h1 = jnp.dot(xb, w1_ref[...], preferred_element_type=f32) + b[0:1, :]
    h1 = jnp.maximum(h1, 0.0)                                  # (TB, 1024) f32

    # maxpool(k=2, s=2): even/odd output positions live in the two halves.
    h1p = jnp.maximum(h1[:, :H1_HALF], h1[:, H1_HALF:]).astype(bf16)  # (TB,512)

    # conv2 + bn2 (folded) + relu2; columns already in torch flatten order.
    h2 = jnp.dot(h1p, w2_ref[...], preferred_element_type=f32) + b[1:2, :H2_W]
    h2 = jnp.maximum(h2, 0.0).astype(bf16)                     # (TB, 896)

    # fc1 + bn3 (folded) + relu3.
    f1 = jnp.dot(h2, wf1_ref[...], preferred_element_type=f32) + b[2:3, :OUT_W]
    f1 = jnp.maximum(f1, 0.0).astype(bf16)                     # (TB, 128)

    # drop1: Dropout(p=0.5) is identity at inference.
    # TODO(synk): training-mode dropout (PRNG mask) / batch-stat BatchNorm not
    # implemented (inference semantics only).

    # fc2, lane-dense 128-wide output; caller slices [:, :NUM_CLASSES].
    out = jnp.dot(f1, wf2_ref[...], preferred_element_type=f32) + b[3:4, :OUT_W]
    out_ref[...] = out.astype(out_ref.dtype)


# =============================================================================
# Wrapper: batch padding + 1-D batch grid, weights resident via constant maps.
# =============================================================================
def _round_up(n, m):
    return ((n + m - 1) // m) * m


def _ceil_div(a, b):
    return -(-a // b)


@functools.partial(jax.jit, static_argnames=("batch_tile",))
def convnet_forward(x_ncl, folded, *, batch_tile=256):
    """x_ncl: (B, 1, L_IN) float32 (PyTorch NCL input). Returns (B, NUM_CLASSES)."""
    B = x_ncl.shape[0]
    x = x_ncl.reshape(B, L_IN)

    # Batch tile: cap at batch_tile (>= 8 rows), and whenever the batch is big
    # enough, keep at least 2 grid steps so both v7x TensorCores get work.
    tb = min(_round_up(batch_tile, 8), _round_up(B, 8))
    if B > 8:
        tb = min(tb, _round_up(_ceil_div(B, 2), 8))
    tb = max(tb, 8)
    bp = _round_up(B, tb)
    grid = (bp // tb,)

    x = jnp.pad(x, ((0, bp - B), (0, X_W - L_IN)))             # (bp, 128) f32

    def resident(shape):
        # Same block index every grid step -> fetched once, stays in VMEM.
        return pl.BlockSpec(shape, lambda i: (0, 0))

    flops = 2 * bp * (X_W * H1_W + H1_HALF * H2_W + H2_W * F1 + F1 * OUT_W)
    bytes_accessed = (4 * bp * X_W + 4 * bp * OUT_W + 4 * 4 * BIAS_W
                      + 2 * (X_W * H1_W + H1_HALF * H2_W + H2_W * F1
                             + F1 * OUT_W))

    out = pl.pallas_call(
        convnet_kernel,
        out_shape=jax.ShapeDtypeStruct((bp, OUT_W), jnp.float32),
        grid_spec=pltpu.PrefetchScalarGridSpec(
            num_scalar_prefetch=0,
            grid=grid,
            in_specs=[
                pl.BlockSpec((tb, X_W), lambda i: (i, 0)),      # x batch tile
                resident((X_W, H1_W)),                          # conv1 banded (bf16)
                resident((H1_HALF, H2_W)),                      # conv2 banded (bf16)
                resident((H2_W, F1)),                           # fc1 (bf16)
                resident((F1, OUT_W)),                          # fc2 padded (bf16)
                resident((4, BIAS_W)),                          # bias stack (f32)
            ],
            out_specs=pl.BlockSpec((tb, OUT_W), lambda i: (i, 0)),
        ),
        compiler_params=pltpu.CompilerParams(
            dimension_semantics=("parallel",)),
        cost_estimate=pl.CostEstimate(flops=flops, transcendentals=0,
                                      bytes_accessed=bytes_accessed),
    )(x, folded["w1"], folded["w2"], folded["wf1"], folded["wf2"],
      folded["bias"])
    return out[:B, :NUM_CLASSES]


# =============================================================================
# Parameter prep: fold inference-mode BN + build lane-aligned banded matrices.
# =============================================================================
def fold_params(p, num_classes=NUM_CLASSES, matmul_dtype=jnp.bfloat16):
    f32 = jnp.float32

    def bn_fold(bn):
        scale = bn["gamma"] / jnp.sqrt(bn["var"] + BN_EPS)
        return scale, bn["beta"] - bn["mean"] * scale

    s1, t1 = bn_fold(p["bn1"])
    s2, t2 = bn_fold(p["bn2"])
    s3, t3 = bn_fold(p["bn3"])

    # ---- conv1 (1->16, k=3, pad=1) + bn1 as banded matmul -------------------
    # columns: [even l | odd l]; each half channel-major (c*25 + j), pad->512.
    w1f = p["w1"][:, 0, :] * s1[:, None]                       # (16, 3)
    li = jnp.arange(L_IN)[:, None]                             # input position
    lo = jnp.arange(L_IN)[None, :]                             # output position
    tap = li - lo + 1
    valid = (tap >= 0) & (tap <= 2)
    toep = jnp.where(valid[None], w1f[:, jnp.clip(tap, 0, 2)], 0.0)  # (16,50,50)

    def conv1_half(parity):
        t = toep[:, :, parity::2]                              # (16, 50, 25)
        t = jnp.transpose(t, (1, 0, 2)).reshape(L_IN, C1 * L_POOL)
        return jnp.pad(t, ((0, 0), (0, H1_HALF - C1 * L_POOL)))

    w1_big = jnp.concatenate([conv1_half(0), conv1_half(1)], axis=1)
    w1_big = jnp.pad(w1_big, ((0, X_W - L_IN), (0, 0))).astype(f32)   # (128,1024)
    b1f = s1 * p["b1"] + t1
    b1_half = jnp.pad(jnp.repeat(b1f, L_POOL), (0, H1_HALF - C1 * L_POOL))
    b1_big = jnp.concatenate([b1_half, b1_half])               # (1024,)

    # ---- conv2 (16->32, k=3, pad=1) + bn2 as banded matmul ------------------
    # rows = pooled conv1 layout (c*25 + j); cols = torch flatten order
    # (o*25 + j), zero-padded to 896.
    w2f = p["w2"] * s2[:, None, None]                          # (32, 16, 3)
    ji = jnp.arange(L_POOL)[:, None]
    jo = jnp.arange(L_POOL)[None, :]
    tap2 = ji - jo + 1
    valid2 = (tap2 >= 0) & (tap2 <= 2)
    blk = jnp.where(valid2[None, None], w2f[:, :, jnp.clip(tap2, 0, 2)], 0.0)
    blk = jnp.transpose(blk, (1, 2, 0, 3)).reshape(C1 * L_POOL, C2 * L_POOL)
    w2_big = jnp.pad(blk, ((0, H1_HALF - C1 * L_POOL),
                           (0, H2_W - C2 * L_POOL))).astype(f32)       # (512,896)
    b2f = s2 * p["b2"] + t2
    b2_big = jnp.pad(jnp.repeat(b2f, L_POOL), (0, BIAS_W - C2 * L_POOL))  # (1024,)

    # ---- fc1 + bn3 (folded), fc2 — padded to lane-dense widths --------------
    wf1_big = jnp.pad((p["wf1"] * s3[:, None]).T,
                      ((0, H2_W - C2 * L_POOL), (0, 0))).astype(f32)    # (896,128)
    bf1_big = jnp.pad(s3 * p["bf1"] + t3, (0, BIAS_W - F1))             # (1024,)
    wf2_big = jnp.zeros((F1, OUT_W), f32).at[:, :num_classes].set(p["wf2"].T)
    bf2_big = jnp.pad(jnp.pad(p["bf2"], (0, OUT_W - num_classes)),
                      (0, BIAS_W - OUT_W))                              # (1024,)

    bias = jnp.stack([b1_big, b2_big, bf1_big, bf2_big]).astype(f32)    # (4,1024)
    return {"w1": w1_big.astype(matmul_dtype),
            "w2": w2_big.astype(matmul_dtype),
            "wf1": wf1_big.astype(matmul_dtype),
            "wf2": wf2_big.astype(matmul_dtype),
            "bias": bias}


def init_params(key, num_classes=NUM_CLASSES):
    """Raw PyTorch-style parameters (default inits + randomized BN stats)."""
    ks = jax.random.split(key, 20)

    def u(k, shape, fan_in):
        b = 1.0 / jnp.sqrt(jnp.float32(fan_in))
        return jax.random.uniform(k, shape, jnp.float32, -b, b)

    def bn_params(k4, c):
        kg, kb, km, kv = k4
        return {"gamma": jax.random.uniform(kg, (c,), jnp.float32, 0.5, 1.5),
                "beta": 0.1 * jax.random.normal(kb, (c,), jnp.float32),
                "mean": 0.1 * jax.random.normal(km, (c,), jnp.float32),
                "var": jax.random.uniform(kv, (c,), jnp.float32, 0.5, 1.5)}

    return {
        "w1": u(ks[0], (C1, 1, 3), 1 * 3), "b1": u(ks[1], (C1,), 1 * 3),
        "w2": u(ks[2], (C2, C1, 3), C1 * 3), "b2": u(ks[3], (C2,), C1 * 3),
        "wf1": u(ks[4], (F1, C2 * L_POOL), C2 * L_POOL),
        "bf1": u(ks[5], (F1,), C2 * L_POOL),
        "wf2": u(ks[6], (num_classes, F1), F1),
        "bf2": u(ks[7], (num_classes,), F1),
        "bn1": bn_params(ks[8:12], C1),
        "bn2": bn_params(ks[12:16], C2),
        "bn3": bn_params(ks[16:20], F1),
    }


# =============================================================================
# Pure-JAX references.
# =============================================================================
def reference_forward(x_ncl, p):
    """Torch-semantics reference on raw params (f32-exact precision)."""
    hp = jax.lax.Precision.HIGHEST
    dn = ("NCH", "OIH", "NCH")

    def bn(h, bnp):
        s = bnp["gamma"] / jnp.sqrt(bnp["var"] + BN_EPS)
        return (h - bnp["mean"][None, :, None]) * s[None, :, None] \
            + bnp["beta"][None, :, None]

    B = x_ncl.shape[0]
    h = jax.lax.conv_general_dilated(x_ncl, p["w1"], (1,), ((1, 1),),
                                     dimension_numbers=dn, precision=hp)
    h = jnp.maximum(bn(h + p["b1"][None, :, None], p["bn1"]), 0.0)
    h = jnp.max(h.reshape(B, C1, L_POOL, 2), axis=-1)
    h = jax.lax.conv_general_dilated(h, p["w2"], (1,), ((1, 1),),
                                     dimension_numbers=dn, precision=hp)
    h = jnp.maximum(bn(h + p["b2"][None, :, None], p["bn2"]), 0.0)
    h = h.reshape(B, -1)
    h = jnp.dot(h, p["wf1"].T, precision=hp) + p["bf1"]
    s3 = p["bn3"]["gamma"] / jnp.sqrt(p["bn3"]["var"] + BN_EPS)
    h = jnp.maximum((h - p["bn3"]["mean"]) * s3 + p["bn3"]["beta"], 0.0)
    return jnp.dot(h, p["wf2"].T, precision=hp) + p["bf2"]


def folded_forward(x_ncl, fp):
    """Plain-jnp version of the exact math the kernel runs (validates folding).

    Pass f32-folded params here to check the banded-matmul restructuring is
    mathematically exact before any bf16 rounding.
    """
    hp = jax.lax.Precision.HIGHEST
    B = x_ncl.shape[0]
    x = jnp.pad(x_ncl.reshape(B, L_IN), ((0, 0), (0, X_W - L_IN)))
    b = fp["bias"]
    w1 = fp["w1"].astype(jnp.float32)
    w2 = fp["w2"].astype(jnp.float32)
    wf1 = fp["wf1"].astype(jnp.float32)
    wf2 = fp["wf2"].astype(jnp.float32)
    h1 = jnp.maximum(jnp.dot(x, w1, precision=hp) + b[0:1, :], 0.0)
    h1p = jnp.maximum(h1[:, :H1_HALF], h1[:, H1_HALF:])
    h2 = jnp.maximum(jnp.dot(h1p, w2, precision=hp) + b[1:2, :H2_W], 0.0)
    f1 = jnp.maximum(jnp.dot(h2, wf1, precision=hp) + b[2:3, :OUT_W], 0.0)
    out = jnp.dot(f1, wf2, precision=hp) + b[3:4, :OUT_W]
    return out[:, :NUM_CLASSES]


if __name__ == "__main__":
    key = jax.random.PRNGKey(0)
    kx, kp = jax.random.split(key)

    B = 4
    x = jax.random.normal(kx, (B, 1, L_IN), jnp.float32)       # PyTorch NCL input
    params = init_params(kp)
    folded_f32 = fold_params(params, matmul_dtype=jnp.float32)
    folded = fold_params(params, matmul_dtype=jnp.bfloat16)

    out = convnet_forward(x, folded)
    out = jax.block_until_ready(out)
    assert out.shape == (B, NUM_CLASSES)

    ref = reference_forward(x, params)
    ff = folded_forward(x, folded_f32)
    # BN-fold + banded-matmul restructuring is mathematically exact in f32:
    assert jnp.allclose(ff, ref, atol=1e-4, rtol=1e-4), (
        f"fold mismatch {jnp.max(jnp.abs(ff - ref))}")
    # Kernel vs f32-exact reference: tolerance covers the explicit bf16 MXU
    # operands (f32 accumulation); structural bugs would be >> 3e-2.
    assert jnp.allclose(out, ref, atol=3e-2, rtol=3e-2), (
        f"kernel mismatch {jnp.max(jnp.abs(out - ref))}")

    print("KERNEL_OK")
</pallas_src>

<mosaic_0001>
module attributes {stable_mosaic.version = 11 : i64} {
  func.func @convnet_kernel(%arg0: i32, %arg1: memref<8x128xf32, #tpu.memory_space<vmem>>, %arg2: memref<128x1024xbf16, #tpu.memory_space<vmem>>, %arg3: memref<512x896xbf16, #tpu.memory_space<vmem>>, %arg4: memref<896x128xbf16, #tpu.memory_space<vmem>>, %arg5: memref<128x128xbf16, #tpu.memory_space<vmem>>, %arg6: memref<4x1024xf32, #tpu.memory_space<vmem>>, %arg7: memref<8x128xf32, #tpu.memory_space<vmem>>) attributes {dimension_semantics = [#tpu.dimension_semantics<parallel>], iteration_bounds = array<i64: 1>, scalar_prefetch = 0 : i64, scratch_operands = 0 : i64, tpu.core_type = #tpu.core_type<tc>, window_params = [{transform_indices = @transform_0, window_bounds = array<i64: 8, 128>}, {pipeline_mode = #tpu.pipeline_mode<synchronous>, transform_indices = @transform_1, window_bounds = array<i64: 128, 1024>}, {pipeline_mode = #tpu.pipeline_mode<synchronous>, transform_indices = @transform_2, window_bounds = array<i64: 512, 896>}, {pipeline_mode = #tpu.pipeline_mode<synchronous>, transform_indices = @transform_3, window_bounds = array<i64: 896, 128>}, {pipeline_mode = #tpu.pipeline_mode<synchronous>, transform_indices = @transform_4, window_bounds = array<i64: 128, 128>}, {pipeline_mode = #tpu.pipeline_mode<synchronous>, transform_indices = @transform_5, window_bounds = array<i64: 4, 1024>}, {transform_indices = @transform_6, window_bounds = array<i64: 8, 128>}]} {
    %c0 = arith.constant 0 : index
    %c0_0 = arith.constant 0 : index
    %0 = vector.load %arg6[%c0, %c0_0] : memref<4x1024xf32, #tpu.memory_space<vmem>>, vector<4x1024xf32>
    %c0_1 = arith.constant 0 : index
    %c0_2 = arith.constant 0 : index
    %1 = vector.load %arg1[%c0_1, %c0_2] : memref<8x128xf32, #tpu.memory_space<vmem>>, vector<8x128xf32>
    %2 = arith.truncf %1 : vector<8x128xf32> to vector<8x128xbf16>
    %c0_3 = arith.constant 0 : index
    %c0_4 = arith.constant 0 : index
    %3 = vector.load %arg2[%c0_3, %c0_4] : memref<128x1024xbf16, #tpu.memory_space<vmem>>, vector<128x1024xbf16>
    %cst = arith.constant dense<0.000000e+00> : vector<8x1024xf32>
    %4 = tpu.matmul %2, %3, %cst {dimension_numbers = #tpu.dot_dimension_numbers<[1], [0], [0], [1], [0, 0, 1, 1], [], []>} : vector<8x128xbf16>, vector<128x1024xbf16>, vector<8x1024xf32> -> vector<8x1024xf32>
    %5 = vector.extract_strided_slice %0 {offsets = [0, 0], sizes = [1, 1024], strides = [1, 1]} : vector<4x1024xf32> to vector<1x1024xf32>
    %6 = vector.broadcast %5 : vector<1x1024xf32> to vector<8x1024xf32>
    %7 = arith.addf %4, %6 : vector<8x1024xf32>
    %cst_5 = arith.constant 0.000000e+00 : f32
    %8 = vector.broadcast %cst_5 : f32 to vector<8x1024xf32>
    %9 = arith.maximumf %7, %8 : vector<8x1024xf32>
    %10 = vector.extract_strided_slice %9 {offsets = [0, 0], sizes = [8, 512], strides = [1, 1]} : vector<8x1024xf32> to vector<8x512xf32>
    %11 = vector.extract_strided_slice %9 {offsets = [0, 512], sizes = [8, 512], strides = [1, 1]} : vector<8x1024xf32> to vector<8x512xf32>
    %12 = arith.maximumf %10, %11 : vector<8x512xf32>
    %13 = arith.truncf %12 : vector<8x512xf32> to vector<8x512xbf16>
    %c0_6 = arith.constant 0 : index
    %c0_7 = arith.constant 0 : index
    %14 = vector.load %arg3[%c0_6, %c0_7] : memref<512x896xbf16, #tpu.memory_space<vmem>>, vector<512x896xbf16>
    %cst_8 = arith.constant dense<0.000000e+00> : vector<8x896xf32>
    %15 = tpu.matmul %13, %14, %cst_8 {dimension_numbers = #tpu.dot_dimension_numbers<[1], [0], [0], [1], [0, 0, 1, 1], [], []>} : vector<8x512xbf16>, vector<512x896xbf16>, vector<8x896xf32> -> vector<8x896xf32>
    %16 = vector.extract_strided_slice %0 {offsets = [1, 0], sizes = [1, 896], strides = [1, 1]} : vector<4x1024xf32> to vector<1x896xf32>
    %17 = vector.broadcast %16 : vector<1x896xf32> to vector<8x896xf32>
    %18 = arith.addf %15, %17 : vector<8x896xf32>
    %cst_9 = arith.constant 0.000000e+00 : f32
    %19 = vector.broadcast %cst_9 : f32 to vector<8x896xf32>
    %20 = arith.maximumf %18, %19 : vector<8x896xf32>
    %21 = arith.truncf %20 : vector<8x896xf32> to vector<8x896xbf16>
    %c0_10 = arith.constant 0 : index
    %c0_11 = arith.constant 0 : index
    %22 = vector.load %arg4[%c0_10, %c0_11] : memref<896x128xbf16, #tpu.memory_space<vmem>>, vector<896x128xbf16>
    %cst_12 = arith.constant dense<0.000000e+00> : vector<8x128xf32>
    %23 = tpu.matmul %21, %22, %cst_12 {dimension_numbers = #tpu.dot_dimension_numbers<[1], [0], [0], [1], [0, 0, 1, 1], [], []>} : vector<8x896xbf16>, vector<896x128xbf16>, vector<8x128xf32> -> vector<8x128xf32>
    %24 = vector.extract_strided_slice %0 {offsets = [2, 0], sizes = [1, 128], strides = [1, 1]} : vector<4x1024xf32> to vector<1x128xf32>
    %25 = vector.broadcast %24 : vector<1x128xf32> to vector<8x128xf32>
    %26 = arith.addf %23, %25 : vector<8x128xf32>
    %cst_13 = arith.constant 0.000000e+00 : f32
    %27 = vector.broadcast %cst_13 : f32 to vector<8x128xf32>
    %28 = arith.maximumf %26, %27 : vector<8x128xf32>
    %29 = arith.truncf %28 : vector<8x128xf32> to vector<8x128xbf16>
    %c0_14 = arith.constant 0 : index
    %c0_15 = arith.constant 0 : index
    %30 = vector.load %arg5[%c0_14, %c0_15] : memref<128x128xbf16, #tpu.memory_space<vmem>>, vector<128x128xbf16>
    %cst_16 = arith.constant dense<0.000000e+00> : vector<8x128xf32>
    %31 = tpu.matmul %29, %30, %cst_16 {dimension_numbers = #tpu.dot_dimension_numbers<[1], [0], [0], [1], [0, 0, 1, 1], [], []>} : vector<8x128xbf16>, vector<128x128xbf16>, vector<8x128xf32> -> vector<8x128xf32>
    %32 = vector.extract_strided_slice %0 {offsets = [3, 0], sizes = [1, 128], strides = [1, 1]} : vector<4x1024xf32> to vector<1x128xf32>
    %33 = vector.broadcast %32 : vector<1x128xf32> to vector<8x128xf32>
    %34 = arith.addf %31, %33 : vector<8x128xf32>
    %c0_17 = arith.constant 0 : index
    %c0_18 = arith.constant 0 : index
    %35 = vector.load %arg7[%c0_17, %c0_18] : memref<8x128xf32, #tpu.memory_space<vmem>>, vector<8x128xf32>
    tpu.vector_store %arg7[%c0_17, %c0_18], %34 {strides = array<i32>} : memref<8x128xf32, #tpu.memory_space<vmem>>, vector<8x128xf32>,
    return
  }
  func.func @transform_0(%arg0: i32) -> (i32, i32) {
    %c0_i32 = arith.constant 0 : i32
    %c0_i32_0 = arith.constant 0 : i32
    return %arg0, %c0_i32 : i32, i32
  }
  func.func @transform_1(%arg0: i32) -> (i32, i32) {
    %c0_i32 = arith.constant 0 : i32
    %c0_i32_0 = arith.constant 0 : i32
    %c0_i32_1 = arith.constant 0 : i32
    return %c0_i32, %c0_i32_0 : i32, i32
  }
  func.func @transform_2(%arg0: i32) -> (i32, i32) {
    %c0_i32 = arith.constant 0 : i32
    %c0_i32_0 = arith.constant 0 : i32
    %c0_i32_1 = arith.constant 0 : i32
    return %c0_i32, %c0_i32_0 : i32, i32
  }
  func.func @transform_3(%arg0: i32) -> (i32, i32) {
    %c0_i32 = arith.constant 0 : i32
    %c0_i32_0 = arith.constant 0 : i32
    %c0_i32_1 = arith.constant 0 : i32
    return %c0_i32, %c0_i32_0 : i32, i32
  }
  func.func @transform_4(%arg0: i32) -> (i32, i32) {
    %c0_i32 = arith.constant 0 : i32
    %c0_i32_0 = arith.constant 0 : i32
    %c0_i32_1 = arith.constant 0 : i32
    return %c0_i32, %c0_i32_0 : i32, i32
  }
  func.func @transform_5(%arg0: i32) -> (i32, i32) {
    %c0_i32 = arith.constant 0 : i32
    %c0_i32_0 = arith.constant 0 : i32
    %c0_i32_1 = arith.constant 0 : i32
    return %c0_i32, %c0_i32_0 : i32, i32
  }
  func.func @transform_6(%arg0: i32) -> (i32, i32) {
    %c0_i32 = arith.constant 0 : i32
    %c0_i32_0 = arith.constant 0 : i32
    return %arg0, %c0_i32 : i32, i32
  }
}

</mosaic_0001>

<bundles_post_ra>
// kernel: convnet_forward.1
= control target key start
LH: loop header
LB: loop body
LE: loop exit
PB: predicated region body
PF: predicated region fallthrough
CT: control target
= control target key end

     0   :  { %11 = vsyncpa [#allocation3], 0  ;;  %s4549_s0 = inlined_call_operand.vmem [shape: f32[8,128], index: 0, kind: input, shape index: {}]   ;;  %s4550_s1 = inlined_call_operand.hbm [shape: bf16[128,1024], index: 1, kind: input, shape index: {}]   ;;  %s4551_s2 = inlined_call_operand.hbm [shape: bf16[512,896], index: 2, kind: input, shape index: {}]   ;;  %s4552_s3 = inlined_call_operand.hbm [shape: bf16[896,128], index: 3, kind: input, shape index: {}]   ;;  %s4553_s4 = inlined_call_operand.hbm [shape: bf16[128,128], index: 4, kind: input, shape index: {}]   ;;  %s4554_s5 = inlined_call_operand.hbm [shape: f32[4,1024], index: 5, kind: input, shape index: {}]   ;;  %s4555_s6 = inlined_call_operand.vmem [shape: f32[8,128], index: 6, kind: output, shape index: {}]  }
   0x1   :  { %12 = vsyncpa [#allocation5], 0 }
   0x2   :  { %13 = vsyncpa [#allocation8], 0  ;;  %s4332_s21 = smov [#allocation4]   ;;  %s4216_s25 = scalar_lea.hbm %s4551_s2, 28672 }
   0x3   :  { %s33_s22 = sshll.u32 %s4332_s21, 4  ;;  %p4217_p0 = scmp.ne.s32.totalorder %s4551_s2, %s4216_s25  ;;  %s34_s22 = int_to_ptr.vmem [resolvable:$true] %s33_s22 }
   0x4   :  { %p4220_p1 = scmp.lt.u32.totalorder %s4216_s25, %s4551_s2 }
   0x6   :  { %p4222_p2 = pnand %p4220_p1, %p4217_p0 }
   0x8   :  { %4225 = shalt.err (!%p4222_p2)
}
   0x9   :  { %s4226_s30 = scalar_lea.vmem %s34_s22, 28672  ;;  %p4231_p4 = scmp.lt.s32.totalorder %s34_s22, %s34_s22 }
   0xa   :  { %p4227_p3 = scmp.ne.s32.totalorder %s34_s22, %s4226_s30  ;;  %p4232_p5 = scmp.lt.s32.totalorder %s4226_s30, %s4226_s30 }
   0xc   :  { %p4233_p6 = por %p4232_p5, %p4231_p4 }
   0xe   :  { %p4234_p7 = pnand %p4233_p6, %p4227_p3 }
  0x10   :  { %4237 = shalt.err (!%p4234_p7)
}
  0x11   :  { %s4333_s7 = smov 448   ;;  %s4334_s8 = smov 28  }
  0x12   :  { %39 = dma.hbm_to_vmem [thread:$0]  %s4551_s2, 28672, %s34_s22, [#allocation5], %s4333_s7, %s4333_s7, %s4334_s8  }
  0x13   :  { %s4335_s11 = smov [#allocation7]   ;;  %s4336_s13 = smov [#allocation2]  }
  0x14   :  { %s57_s12 = sshll.u32 %s4335_s11, 4  ;;  %s21_s14 = sshll.u32 %s4336_s13, 4  ;;  %s58_s12 = int_to_ptr.vmem [resolvable:$true] %s57_s12  ;;  %s22_s14 = int_to_ptr.vmem [resolvable:$true] %s21_s14 }
  0x15   :  { %s4238_s17 = scalar_lea.hbm %s4553_s4, 1024 }
  0x16   :  { %p4239_p8 = scmp.ne.s32.totalorder %s4553_s4, %s4238_s17  ;;  %p4242_p9 = scmp.lt.u32.totalorder %s4238_s17, %s4553_s4 }
  0x18   :  { %p4244_p10 = pnand %p4242_p9, %p4239_p8 }
  0x1a   :  { %4247 = shalt.err (!%p4244_p10)
}
  0x1b   :  { %s4248_s2 = scalar_lea.vmem %s58_s12, 1024  ;;  %p4253_p12 = scmp.lt.s32.totalorder %s58_s12, %s58_s12 }
  0x1c   :  { %p4249_p11 = scmp.ne.s32.totalorder %s58_s12, %s4248_s2  ;;  %p4254_p13 = scmp.lt.s32.totalorder %s4248_s2, %s4248_s2 }
  0x1e   :  { %p4255_p0 = por %p4254_p13, %p4253_p12 }
  0x20   :  { %p4256_p1 = pnand %p4255_p0, %p4249_p11 }
  0x22   :  { %4259 = shalt.err (!%p4256_p1)
}
  0x23   :  { %s4337_s22 = smov 64   ;;  %s4338_s23 = smov 4  }
  0x24   :  { %63 = dma.hbm_to_vmem [thread:$0]  %s4553_s4, 1024, %s58_s12, [#allocation8], %s4337_s22, %s4337_s22, %s4338_s23  }
  0x25   :  { %s4260_s28 = scalar_lea.hbm %s4550_s1, 8192 }
  0x26   :  { %p4261_p2 = scmp.ne.s32.totalorder %s4550_s1, %s4260_s28  ;;  %p4264_p3 = scmp.lt.u32.totalorder %s4260_s28, %s4550_s1 }
  0x28   :  { %p4266_p4 = pnand %p4264_p3, %p4261_p2 }
  0x2a   :  { %4269 = shalt.err (!%p4266_p4)
}
  0x2b   :  { %s4270_s9 = scalar_lea.vmem %s22_s14, 8192  ;;  %p4275_p6 = scmp.lt.s32.totalorder %s22_s14, %s22_s14 }
  0x2c   :  { %p4271_p5 = scmp.ne.s32.totalorder %s22_s14, %s4270_s9  ;;  %p4276_p7 = scmp.lt.s32.totalorder %s4270_s9, %s4270_s9 }
  0x2e   :  { %p4277_p8 = por %p4276_p7, %p4275_p6 }
  0x30   :  { %p4278_p9 = pnand %p4277_p8, %p4271_p5 }
  0x32   :  { %4281 = shalt.err (!%p4278_p9)
}
  0x33   :  { %s4339_s4 = smov 512   ;;  %s4340_s10 = smov 32  }
  0x34   :  { %27 = dma.hbm_to_vmem [thread:$0]  %s4550_s1, 8192, %s22_s14, [#allocation3], %s4339_s4, %s4339_s4, %s4340_s10  }
  0x35   :  { %s4341_s13 = smov [#allocation6]   ;;  %s4342_s16 = smov [#allocation9]  }
  0x36   :  { %s45_s15 = sshll.u32 %s4341_s13, 4  ;;  %s70_s17 = sshll.u32 %s4342_s16, 4  ;;  %s46_s15 = int_to_ptr.vmem [resolvable:$true] %s45_s15  ;;  %s71_s17 = int_to_ptr.vmem [resolvable:$true] %s70_s17 }
  0x37   :  { %s4282_s20 = scalar_lea.hbm %s4552_s3, 7168 }
  0x38   :  { %p4283_p10 = scmp.ne.s32.totalorder %s4552_s3, %s4282_s20  ;;  %p4286_p11 = scmp.lt.u32.totalorder %s4282_s20, %s4552_s3 }
  0x3a   :  { %p4288_p12 = pnand %p4286_p11, %p4283_p10 }
  0x3c   :  { %4291 = shalt.err (!%p4288_p12)
}
  0x3d   :  { %s4292_s1 = scalar_lea.vmem %s46_s15, 7168  ;;  %p4297_p0 = scmp.lt.s32.totalorder %s46_s15, %s46_s15 }
  0x3e   :  { %p4293_p13 = scmp.ne.s32.totalorder %s46_s15, %s4292_s1  ;;  %p4298_p1 = scmp.lt.s32.totalorder %s4292_s1, %s4292_s1 }
  0x40   :  { %p4299_p2 = por %p4298_p1, %p4297_p0 }
  0x42   :  { %p4300_p3 = pnand %p4299_p2, %p4293_p13 }
  0x44   :  { %4303 = shalt.err (!%p4300_p3)
}
  0x45   :  { %51 = dma.hbm_to_vmem [thread:$0]  %s4552_s3, 7168, %s46_s15, [#allocation5], %s4337_s22, %s4337_s22, %s4338_s23  }
  0x46   :  { %s4304_s29 = scalar_lea.hbm %s4554_s5, 512 }
  0x47   :  { %p4305_p4 = scmp.ne.s32.totalorder %s4554_s5, %s4304_s29  ;;  %p4308_p5 = scmp.lt.u32.totalorder %s4304_s29, %s4554_s5 }
  0x49   :  { %p4310_p6 = pnand %p4308_p5, %p4305_p4 }
  0x4b   :  { %4313 = shalt.err (!%p4310_p6)
}
  0x4c   :  { %s4314_s4 = scalar_lea.vmem %s71_s17, 512  ;;  %p4319_p8 = scmp.lt.s32.totalorder %s71_s17, %s71_s17 }
  0x4d   :  { %p4315_p7 = scmp.ne.s32.totalorder %s71_s17, %s4314_s4  ;;  %p4320_p9 = scmp.lt.s32.totalorder %s4314_s4, %s4314_s4 }
  0x4f   :  { %p4321_p10 = por %p4320_p9, %p4319_p8 }
  0x51   :  { %p4322_p11 = pnand %p4321_p10, %p4315_p7 }
  0x53   :  { %4325 = shalt.err (!%p4322_p11)
}
  0x54   :  { %73 = dma.hbm_to_vmem [thread:$0]  %s4554_s5, 512, %s71_s17, [#allocation8]  }
  0x55   :  { %4326 = dma.done.wait [#allocation3], 8192  }
  0x56   :  { %4327 = vsyncadd [#allocation3], 4294959104 }
  0x57   :  { %4328 = dma.done.wait [#allocation5], 35840  }
  0x58   :  { %4329 = vsyncadd [#allocation5], 4294931456 }
  0x59   :  { %4330 = dma.done.wait [#allocation8], 1536  }
  0x5a   :  { %4331 = vsyncadd [#allocation8], 4294965760  ;;  %v4343_v0 = vmov 0   ;;  %v96_v1 = vld [vmem:[#allocation2] sm:$0xff]  ;;  %v97_v12 = vld [vmem:[#allocation2 + $0x8] sm:$0xff]  ;;  %vm4345_vm0 = vmmov 0  }
  0x5b   :  { %588 = vmatprep.mubr.bf16.mxu0 %v4343_v0  ;;  %629 = vmatprep.mubr.bf16.mxu1 %v4343_v0  ;;  %v100_v2 = vld [vmem:[#allocation2 + $0x20] sm:$0xff]  ;;  %v101_v15 = vld [vmem:[#allocation2 + $0x28] sm:$0xff]  ;;  %v98_v58 = vld [vmem:[#allocation2 + $0x10] sm:$0xff] }
  0x5c   :  { %v104_v3 = vld [vmem:[#allocation2 + $0x40] sm:$0xff]  ;;  %v3278_v4 = vcombine.high %v96_v1, %v100_v2  ;;  %v3277_v5 = vcombine.low %v96_v1, %v100_v2  ;;  %v3280_v16 = vcombine.high %v97_v12, %v101_v15  ;;  %v3279_v17 = vcombine.low %v97_v12, %v101_v15  ;;  %v105_v18 = vld [vmem:[#allocation2 + $0x48] sm:$0xff]  ;;  %v102_v59 = vld [vmem:[#allocation2 + $0x30] sm:$0xff] }
  0x5d   :  { %v108_v6 = vld [vmem:[#allocation2 + $0x60] sm:$0xff]  ;;  %v109_v19 = vld [vmem:[#allocation2 + $0x68] sm:$0xff]  ;;  %v3282_v2 = vcombine.high %v98_v58, %v102_v59  ;;  %v114_v12 = vld [vmem:[#allocation2 + $0x90] sm:$0xff] }
  0x5e   :  { %v3286_v7 = vcombine.high %v104_v3, %v108_v6  ;;  %v112_v8 = vld [vmem:[#allocation2 + $0x80] sm:$0xff]  ;;  %556 = vmatprep.subr.bf16.mxu0 %v3278_v4  ;;  %v3285_v10 = vcombine.low %v104_v3, %v108_v6  ;;  %v3288_v21 = vcombine.high %v105_v18, %v109_v19  ;;  %v113_v22 = vld [vmem:[#allocation2 + $0x88] sm:$0xff]  ;;  %597 = vmatprep.subr.bf16.mxu1 %v3280_v16  ;;  %v106_v3 = vld [vmem:[#allocation2 + $0x50] sm:$0xff] }
  0x5f   :  { %v116_v9 = vld [vmem:[#allocation2 + $0xa0] sm:$0xff]  ;;  %557 = vmatpush1.bf16.msra.mxu0 %v3277_v5  ;;  %v117_v23 = vld [vmem:[#allocation2 + $0xa8] sm:$0xff]  ;;  %598 = vmatpush1.bf16.msra.mxu1 %v3279_v17  ;;  %v3287_v27 = vcombine.low %v105_v18, %v109_v19  ;;  %v110_v4 = vld [vmem:[#allocation2 + $0x70] sm:$0xff] }
  0x60   :  { %558 = vmatprep.subr.bf16.mxu0 %v3286_v7  ;;  %v3294_v11 = vcombine.high %v112_v8, %v116_v9  ;;  %v120_v13 = vld [vmem:[#allocation2 + $0xc0] sm:$0xff]  ;;  %v3293_v20 = vcombine.low %v112_v8, %v116_v9  ;;  %599 = vmatprep.subr.bf16.mxu1 %v3288_v21  ;;  %v3296_v28 = vcombine.high %v113_v22, %v117_v23  ;;  %v121_v30 = vld [vmem:[#allocation2 + $0xc8] sm:$0xff]  ;;  %v99_v8 = vld [vmem:[#allocation2 + $0x18] sm:$0xff] }
  0x61   :  { %v124_v14 = vld [vmem:[#allocation2 + $0xe0] sm:$0xff]  ;;  %v125_v31 = vld [vmem:[#allocation2 + $0xe8] sm:$0xff]  ;;  %v3295_v35 = vcombine.low %v113_v22, %v117_v23  ;;  %v3281_v9 = vcombine.low %v98_v58, %v102_v59  ;;  %v107_v16 = vld [vmem:[#allocation2 + $0x58] sm:$0xff]  ;;  %v3289_v17 = vcombine.low %v106_v3, %v110_v4 }
  0x62   :  { %v3302_v24 = vcombine.high %v120_v13, %v124_v14  ;;  %v128_v25 = vld [vmem:[#allocation2 + $0x100] sm:$0xff]  ;;  %v3301_v29 = vcombine.low %v120_v13, %v124_v14  ;;  %v3304_v36 = vcombine.high %v121_v30, %v125_v31  ;;  %v129_v38 = vld [vmem:[#allocation2 + $0x108] sm:$0xff]  ;;  %v3303_v43 = vcombine.low %v121_v30, %v125_v31  ;;  %v118_v13 = vld [vmem:[#allocation2 + $0xb0] sm:$0xff] }
  0x63   :  { %559 = vmatpush1.bf16.msra.mxu0 %v3285_v10  ;;  %v132_v26 = vld [vmem:[#allocation2 + $0x120] sm:$0xff]  ;;  %600 = vmatpush1.bf16.msra.mxu1 %v3287_v27  ;;  %v133_v39 = vld [vmem:[#allocation2 + $0x128] sm:$0xff]  ;;  %v103_v10 = vld [vmem:[#allocation2 + $0x38] sm:$0xff]  ;;  %v3298_v19 = vcombine.high %v114_v12, %v118_v13 }
  0x64   :  { %560 = vmatprep.subr.bf16.mxu0 %v3294_v11  ;;  %v3310_v32 = vcombine.high %v128_v25, %v132_v26  ;;  %v136_v33 = vld [vmem:[#allocation2 + $0x140] sm:$0xff]  ;;  %601 = vmatprep.subr.bf16.mxu1 %v3296_v28  ;;  %v3309_v37 = vcombine.low %v128_v25, %v132_v26  ;;  %v3312_v44 = vcombine.high %v129_v38, %v133_v39  ;;  %v137_v46 = vld [vmem:[#allocation2 + $0x148] sm:$0xff]  ;;  %v111_v18 = vld [vmem:[#allocation2 + $0x78] sm:$0xff] }
  0x65   :  { %v140_v34 = vld [vmem:[#allocation2 + $0x160] sm:$0xff]  ;;  %v141_v47 = vld [vmem:[#allocation2 + $0x168] sm:$0xff]  ;;  %v3311_v51 = vcombine.low %v129_v38, %v133_v39  ;;  %v3290_v11 = vcombine.high %v106_v3, %v110_v4  ;;  %v3284_v15 = vcombine.high %v99_v8, %v103_v10  ;;  %v126_v21 = vld [vmem:[#allocation2 + $0xf0] sm:$0xff]  ;;  %v3283_v22 = vcombine.low %v99_v8, %v103_v10 }
  0x66   :  { %v3318_v40 = vcombine.high %v136_v33, %v140_v34  ;;  %v144_v41 = vld [vmem:[#allocation2 + $0x180] sm:$0xff]  ;;  %v3317_v45 = vcombine.low %v136_v33, %v140_v34  ;;  %v3320_v52 = vcombine.high %v137_v46, %v141_v47  ;;  %v145_v53 = vld [vmem:[#allocation2 + $0x188] sm:$0xff]  ;;  %v3319_v60 = vcombine.low %v137_v46, %v141_v47  ;;  %v115_v23 = vld [vmem:[#allocation2 + $0x98] sm:$0xff] }
  0x67   :  { %561 = vmatpush1.bf16.msra.mxu0 %v3293_v20  ;;  %v148_v42 = vld [vmem:[#allocation2 + $0x1a0] sm:$0xff]  ;;  %602 = vmatpush1.bf16.msra.mxu1 %v3295_v35  ;;  %v149_v55 = vld [vmem:[#allocation2 + $0x1a8] sm:$0xff]  ;;  %v122_v20 = vld [vmem:[#allocation2 + $0xd0] sm:$0xff]  ;;  %v3292_v25 = vcombine.high %v107_v16, %v111_v18  ;;  %v3297_v26 = vcombine.low %v114_v12, %v118_v13  ;;  %v3291_v30 = vcombine.low %v107_v16, %v111_v18 }
  0x68   :  { %562 = vmatprep.subr.bf16.mxu0 %v3302_v24  ;;  %603 = vmatprep.subr.bf16.mxu1 %v3304_v36  ;;  %v3326_v48 = vcombine.high %v144_v41, %v148_v42  ;;  %v152_v49 = vld [vmem:[#allocation2 + $0x1c0] sm:$0xff]  ;;  %v3325_v54 = vcombine.low %v144_v41, %v148_v42  ;;  %v3328_v61 = vcombine.high %v145_v53, %v149_v55  ;;  %v153_v62 = vld [vmem:[#allocation2 + $0x1c8] sm:$0xff]  ;;  %v119_v24 = vld [vmem:[#allocation2 + $0xb8] sm:$0xff] }
  0x69   :  { %v156_v50 = vld [vmem:[#allocation2 + $0x1e0] sm:$0xff]  ;;  %v157_v1 = vld [vmem:[#allocation2 + $0x1e8] sm:$0xff]  ;;  %v3327_v5 = vcombine.low %v145_v53, %v149_v55  ;;  %v130_v27 = vld [vmem:[#allocation2 + $0x110] sm:$0xff]  ;;  %v3300_v33 = vcombine.high %v115_v23, %v119_v24  ;;  %v3305_v34 = vcombine.low %v122_v20, %v126_v21  ;;  %v3299_v38 = vcombine.low %v115_v23, %v119_v24 }
  0x6a   :  { %v3334_v56 = vcombine.high %v152_v49, %v156_v50  ;;  %v94_v57 = vld [vmem:[%s4549_s0] sm:$0xff]  ;;  %v3333_v63 = vcombine.low %v152_v49, %v156_v50  ;;  %v3336_v7 = vcombine.high %v153_v62, %v157_v1  ;;  %v3335_v14 = vcombine.low %v153_v62, %v157_v1  ;;  %v134_v28 = vld [vmem:[#allocation2 + $0x130] sm:$0xff]  ;;  %v123_v31 = vld [vmem:[#allocation2 + $0xd8] sm:$0xff] }
  0x6b   :  { %563 = vmatpush1.bf16.msra.mxu0 %v3301_v29  ;;  %604 = vmatpush1.bf16.msra.mxu1 %v3303_v43  ;;  %v4452_v6 = vpack.c.bf16 %v94_v57, %v94_v57  ;;  %v3306_v29 = vcombine.high %v122_v20, %v126_v21  ;;  %v138_v35 = vld [vmem:[#allocation2 + $0x150] sm:$0xff]  ;;  %v131_v39 = vld [vmem:[#allocation2 + $0x118] sm:$0xff]  ;;  %v3313_v42 = vcombine.low %v130_v27, %v134_v28  ;;  %v3840_v12 = vld [vmem:[#allocation4 + $0x44] ss:$28 sps:$4 sm:$0xff]  }
  0x6c   :  { %564 = vmatprep.subr.bf16.mxu0 %v3310_v32  ;;  %605 = vmatprep.subr.bf16.mxu1 %v3312_v44  ;;  %v127_v32 = vld [vmem:[#allocation2 + $0xf8] sm:$0xff]  ;;  %v142_v36 = vld [vmem:[#allocation2 + $0x170] sm:$0xff]  ;;  %v3855_v18 = vld [vmem:[#allocation4 + $0xe4] ss:$28 sps:$4 sm:$0xff]  }
  0x6d   :  { %v3308_v41 = vcombine.high %v123_v31, %v127_v32  ;;  %v146_v43 = vld [vmem:[#allocation2 + $0x190] sm:$0xff]  ;;  %v139_v46 = vld [vmem:[#allocation2 + $0x158] sm:$0xff]  ;;  %v3321_v49 = vcombine.low %v138_v35, %v142_v36  ;;  %v3858_v24 = vld [vmem:[#allocation4 + $0xec] ss:$28 sps:$4 sm:$0xff]  }
  0x6e   :  { %v150_v44 = vld [vmem:[#allocation2 + $0x1b0] sm:$0xff]  ;;  %v143_v47 = vld [vmem:[#allocation2 + $0x178] sm:$0xff] }
  0x6f   :  { %565 = vmatpush1.bf16.msra.mxu0 %v3309_v37  ;;  %606 = vmatpush1.bf16.msra.mxu1 %v3311_v51  ;;  %v3314_v37 = vcombine.high %v130_v27, %v134_v28  ;;  %v154_v50 = vld [vmem:[#allocation2 + $0x1d0] sm:$0xff]  ;;  %v151_v55 = vld [vmem:[#allocation2 + $0x1b8] sm:$0xff]  ;;  %v3329_v57 = vcombine.low %v146_v43, %v150_v44  ;;  %v3323_v59 = vcombine.low %v139_v46, %v143_v47 }
  0x70   :  { %566 = vmatprep.subr.bf16.mxu0 %v3318_v40  ;;  %607 = vmatprep.subr.bf16.mxu1 %v3320_v52  ;;  %v135_v40 = vld [vmem:[#allocation2 + $0x138] sm:$0xff]  ;;  %v158_v51 = vld [vmem:[#allocation2 + $0x1f0] sm:$0xff]  ;;  %v3330_v52 = vcombine.high %v146_v43, %v150_v44 }
  0x71   :  { %v3315_v53 = vcombine.low %v131_v39, %v135_v40  ;;  %v3338_v58 = vcombine.high %v154_v50, %v158_v51  ;;  %v3337_v1 = vcombine.low %v154_v50, %v158_v51  ;;  %v3829_v3 = vld [vmem:[#allocation4] ss:$28 sps:$4 sm:$0xff]   ;;  %v3843_v10 = vld [vmem:[#allocation4 + $0x74] ss:$28 sps:$4 sm:$0xff]  }
  0x72   :  { %v3841_v13 = vld [vmem:[#allocation4 + $0x70] ss:$28 sps:$4 sm:$0xff]   ;;  %v3846_v16 = vld [vmem:[#allocation4 + $0x7c] ss:$28 sps:$4 sm:$0xff]   ;;  %v3903_v51 = vld [vmem:[#allocation4 + $0x2a4] ss:$28 sps:$4 sm:$0xff]  }
  0x73   :  { %567 = vmatpush1.bf16.msra.mxu0 %v3317_v45  ;;  %608 = vmatpush1.bf16.msra.mxu1 %v3319_v60  ;;  %v3307_v45 = vcombine.low %v123_v31, %v127_v32  ;;  %v155_v60 = vld [vmem:[#allocation2 + $0x1d8] sm:$0xff]  ;;  %v3852_v20 = vld [vmem:[#allocation4 + $0xb4] ss:$28 sps:$4 sm:$0xff]   ;;  %v3871_v32 = vld [vmem:[#allocation4 + $0x188] ss:$28 sps:$4 sm:$0xff]  }
  0x74   :  { %568 = vmatprep.subr.bf16.mxu0 %v3326_v48  ;;  %609 = vmatprep.subr.bf16.mxu1 %v3328_v61  ;;  %v3316_v48 = vcombine.high %v131_v39, %v135_v40  ;;  %v159_v61 = vld [vmem:[#allocation2 + $0x1f8] sm:$0xff]  ;;  %v3850_v23 = vld [vmem:[#allocation4 + $0xb0] ss:$28 sps:$4 sm:$0xff]   ;;  %v3880_v39 = vld [vmem:[#allocation4 + $0x1c8] ss:$28 sps:$4 sm:$0xff]  }
  0x75   :  { %v3340_v4 = vcombine.high %v155_v60, %v159_v61  ;;  %v3339_v8 = vcombine.low %v155_v60, %v159_v61  ;;  %v3853_v21 = vld [vmem:[#allocation4 + $0xe0] ss:$28 sps:$4 sm:$0xff]   ;;  %v3867_v28 = vld [vmem:[#allocation4 + $0x154] ss:$28 sps:$4 sm:$0xff]  }
  0x76   :  { %v3862_v27 = vld [vmem:[#allocation4 + $0x120] ss:$28 sps:$4 sm:$0xff]   ;;  %v3868_v31 = vld [vmem:[#allocation4 + $0x158] ss:$28 sps:$4 sm:$0xff]   ;;  %v3898_v50 = vld [vmem:[#allocation4 + $0x270] ss:$28 sps:$4 sm:$0xff]  }
  0x77   :  { %569 = vmatpush1.bf16.msra.mxu0 %v3325_v54  ;;  %610 = vmatpush1.bf16.msra.mxu1 %v3327_v5  ;;  %v147_v54 = vld [vmem:[#allocation2 + $0x198] sm:$0xff]  ;;  %v3891_v44 = vld [vmem:[#allocation4 + $0x234] ss:$28 sps:$4 sm:$0xff]  }
  0x78   :  { %570 = vmatprep.subr.bf16.mxu0 %v3334_v56  ;;  %611 = vmatprep.subr.bf16.mxu1 %v3336_v7  ;;  %v3324_v56 = vcombine.high %v139_v46, %v143_v47  ;;  %v3332_v62 = vcombine.high %v147_v54, %v151_v55  ;;  %v3837_v5 = vld [vmem:[#allocation4 + $0x3c] ss:$28 sps:$4 sm:$0xff]   ;;  %v3834_v7 = vld [vmem:[#allocation4 + $0xc] ss:$28 sps:$4 sm:$0xff]  }
  0x79   :  { %v3885_v40 = vld [vmem:[#allocation4 + $0x1fc] ss:$28 sps:$4 sm:$0xff]   ;;  %v3897_v47 = vld [vmem:[#allocation4 + $0x26c] ss:$28 sps:$4 sm:$0xff]  }
  0x7a   :  { %v3886_v43 = vld [vmem:[#allocation4 + $0x200] ss:$28 sps:$4 sm:$0xff]   ;;  %v3892_v46 = vld [vmem:[#allocation4 + $0x238] ss:$28 sps:$4 sm:$0xff]   ;;  %v3913_v61 = vld [vmem:[#allocation4 + $0x310] ss:$28 sps:$4 sm:$0xff]  }
  0x7b   :  { %571 = vmatpush1.bf16.msra.mxu0 %v3333_v63  ;;  %612 = vmatpush1.bf16.msra.mxu1 %v3335_v14  ;;  %v3831_v63 = vld [vmem:[#allocation4 + $0x4] ss:$28 sps:$4 sm:$0xff]   ;;  %v3849_v14 = vld [vmem:[#allocation4 + $0xac] ss:$28 sps:$4 sm:$0xff]   ;;  %v3918_v60 = vld [vmem:[#allocation4 + $0x31c] ss:$28 sps:$4 sm:$0xff]  }
  0x7c   :  { %638 = vmatprep.subr.bf16.mxu0 %v3282_v2  ;;  %679 = vmatprep.subr.bf16.mxu1 %v3284_v15  ;;  %v3331_v2 = vcombine.low %v147_v54, %v151_v55  ;;  %v3838_v15 = vld [vmem:[#allocation4 + $0x40] ss:$28 sps:$4 sm:$0xff]   ;;  %v3904_v54 = vld [vmem:[#allocation4 + $0x2a8] ss:$28 sps:$4 sm:$0xff]  }
  0x7d   :  { %v3909_v55 = vld [vmem:[#allocation4 + $0x2dc] ss:$28 sps:$4 sm:$0xff]  }
  0x7e   :  { %589 = vmatmul.mubr.bf16.vlgmr.msra.gmra.mrb[0].mxu0 %v4452_v6  ;;  %630 = vmatmul.mubr.bf16.vlgmr.msra.gmra.mrb[0].mxu1 %v4452_v6 }
  0x7f   :  { %639 = vmatpush1.bf16.msra.mxu0 %v3281_v9  ;;  %670 = vmatprep.mubr.bf16.mxu0 %v4343_v0  ;;  %v3835_v9 = vld [vmem:[#allocation4 + $0x38] ss:$28 sps:$4 sm:$0xff]  }
  0x80   :  { %640 = vmatprep.subr.bf16.mxu0 %v3290_v11  ;;  %680 = vmatpush1.bf16.msra.mxu1 %v3283_v22  ;;  %v3832_v11 = vld [vmem:[#allocation4 + $0x8] ss:$28 sps:$4 sm:$0xff]   ;;  %v3861_v22 = vld [vmem:[#allocation4 + $0x11c] ss:$28 sps:$4 sm:$0xff]  }
  0x81   :  { %711 = vmatprep.mubr.bf16.mxu1 %v4343_v0  ;;  %681 = vmatprep.subr.bf16.mxu1 %v3292_v25  ;;  %v3322_v0 = vcombine.high %v138_v35, %v142_v36  ;;  %v3856_v25 = vld [vmem:[#allocation4 + $0xe8] ss:$28 sps:$4 sm:$0xff]   ;;  %v3876_v35 = vld [vmem:[#allocation4 + $0x194] ss:$28 sps:$4 sm:$0xff]  }
  0x82   :  { %v3879_v36 = vld [vmem:[#allocation4 + $0x1c4] ss:$28 sps:$4 sm:$0xff]  }
  0x83   :  { %641 = vmatpush1.bf16.msra.mxu0 %v3289_v17  ;;  %v3847_v17 = vld [vmem:[#allocation4 + $0xa8] ss:$28 sps:$4 sm:$0xff]  }
  0x84   :  { %642 = vmatprep.subr.bf16.mxu0 %v3298_v19  ;;  %682 = vmatpush1.bf16.msra.mxu1 %v3291_v30  ;;  %v3844_v19 = vld [vmem:[#allocation4 + $0x78] ss:$28 sps:$4 sm:$0xff]   ;;  %v3865_v30 = vld [vmem:[#allocation4 + $0x150] ss:$28 sps:$4 sm:$0xff]  }
  0x85   :  { %683 = vmatprep.subr.bf16.mxu1 %v3300_v33  ;;  %v3873_v33 = vld [vmem:[#allocation4 + $0x18c] ss:$28 sps:$4 sm:$0xff]  }
  0x87   :  { %643 = vmatpush1.bf16.msra.mxu0 %v3297_v26  ;;  %v3864_v26 = vld [vmem:[#allocation4 + $0x124] ss:$28 sps:$4 sm:$0xff]  }
  0x88   :  { %644 = vmatprep.subr.bf16.mxu0 %v3306_v29  ;;  %684 = vmatpush1.bf16.msra.mxu1 %v3299_v38  ;;  %v3870_v29 = vld [vmem:[#allocation4 + $0x15c] ss:$28 sps:$4 sm:$0xff]  }
  0x89   :  { %685 = vmatprep.subr.bf16.mxu1 %v3308_v41  ;;  %v3877_v38 = vld [vmem:[#allocation4 + $0x1c0] ss:$28 sps:$4 sm:$0xff]  }
  0x8a   :  { %v3888_v41 = vld [vmem:[#allocation4 + $0x204] ss:$28 sps:$4 sm:$0xff]  }
  0x8b   :  { %645 = vmatpush1.bf16.msra.mxu0 %v3305_v34  ;;  %v3874_v34 = vld [vmem:[#allocation4 + $0x190] ss:$28 sps:$4 sm:$0xff]  }
  0x8c   :  { %646 = vmatprep.subr.bf16.mxu0 %v3314_v37  ;;  %686 = vmatpush1.bf16.msra.mxu1 %v3307_v45  ;;  %v3882_v37 = vld [vmem:[#allocation4 + $0x1cc] ss:$28 sps:$4 sm:$0xff]   ;;  %v3894_v45 = vld [vmem:[#allocation4 + $0x23c] ss:$28 sps:$4 sm:$0xff]  }
  0x8d   :  { %687 = vmatprep.subr.bf16.mxu1 %v3316_v48  ;;  %v3900_v48 = vld [vmem:[#allocation4 + $0x274] ss:$28 sps:$4 sm:$0xff]  }
  0x8f   :  { %647 = vmatpush1.bf16.msra.mxu0 %v3313_v42  ;;  %v3883_v42 = vld [vmem:[#allocation4 + $0x1f8] ss:$28 sps:$4 sm:$0xff]  }
  0x90   :  { %648 = vmatprep.subr.bf16.mxu0 %v3322_v0  ;;  %688 = vmatpush1.bf16.msra.mxu1 %v3315_v53  ;;  %v3889_v0 = vld [vmem:[#allocation4 + $0x230] ss:$28 sps:$4 sm:$0xff]   ;;  %v3901_v53 = vld [vmem:[#allocation4 + $0x2a0] ss:$28 sps:$4 sm:$0xff]  }
  0x91   :  { %689 = vmatprep.subr.bf16.mxu1 %v3324_v56  ;;  %v3912_v56 = vld [vmem:[#allocation4 + $0x2e4] ss:$28 sps:$4 sm:$0xff]  }
  0x93   :  { %649 = vmatpush1.bf16.msra.mxu0 %v3321_v49  ;;  %v3895_v49 = vld [vmem:[#allocation4 + $0x268] ss:$28 sps:$4 sm:$0xff]  }
  0x94   :  { %650 = vmatprep.subr.bf16.mxu0 %v3330_v52  ;;  %690 = vmatpush1.bf16.msra.mxu1 %v3323_v59  ;;  %v3906_v52 = vld [vmem:[#allocation4 + $0x2ac] ss:$28 sps:$4 sm:$0xff]   ;;  %v3915_v59 = vld [vmem:[#allocation4 + $0x314] ss:$28 sps:$4 sm:$0xff]  }
  0x95   :  { %691 = vmatprep.subr.bf16.mxu1 %v3332_v62  ;;  %v3916_v62 = vld [vmem:[#allocation4 + $0x318] ss:$28 sps:$4 sm:$0xff]  }
  0x97   :  { %651 = vmatpush1.bf16.msra.mxu0 %v3329_v57  ;;  %v3907_v57 = vld [vmem:[#allocation4 + $0x2d8] ss:$28 sps:$4 sm:$0xff]  }
  0x98   :  { %652 = vmatprep.subr.bf16.mxu0 %v3338_v58  ;;  %692 = vmatpush1.bf16.msra.mxu1 %v3331_v2  ;;  %v3910_v58 = vld [vmem:[#allocation4 + $0x2e0] ss:$28 sps:$4 sm:$0xff]   ;;  %v3919_v2 = vld [vmem:[#allocation4 + $0x348] ss:$28 sps:$4 sm:$0xff]  }
  0x99   :  { %693 = vmatprep.subr.bf16.mxu1 %v3340_v4  ;;  %v3927_v4 = vld [vmem:[#allocation4 + $0x384] ss:$28 sps:$4 sm:$0xff]  }
  0x9b   :  { %653 = vmatpush1.bf16.msra.mxu0 %v3337_v1  ;;  %v3924_v1 = vld [vmem:[#allocation4 + $0x354] ss:$28 sps:$4 sm:$0xff]  }
  0x9c   :  { %2207 = vmatprep.subr.bf16.mxu0 %v3831_v63  ;;  %694 = vmatpush1.bf16.msra.mxu1 %v3339_v8  ;;  %v3921_v63 = vld [vmem:[#allocation4 + $0x34c] ss:$28 sps:$4 sm:$0xff]  }
  0x9d   :  { %2289 = vmatprep.subr.bf16.mxu1 %v3834_v7 }
  0x9e   :  { %671 = vmatmul.mubr.bf16.vlgmr.msra.gmra.mrb[4].mxu0 %v4452_v6 }
  0x9f   :  { %2208 = vmatpush1.bf16.msra.mxu0 %v3829_v3  ;;  %712 = vmatmul.mubr.bf16.vlgmr.msra.gmra.mrb[4].mxu1 %v4452_v6  ;;  %v3859_v6 = vld [vmem:[#allocation4 + $0x118] ss:$28 sps:$4 sm:$0xff]   ;;  %v3922_v3 = vld [vmem:[#allocation4 + $0x350] ss:$28 sps:$4 sm:$0xff]  }
  0xa0   :  { %2209 = vmatprep.subr.bf16.mxu0 %v3837_v5  ;;  %2290 = vmatpush1.bf16.msra.mxu1 %v3832_v11  ;;  %v3930_v5 = vld [vmem:[#allocation4 + $0x38c] ss:$28 sps:$4 sm:$0xff]  }
  0xa1   :  { %2291 = vmatprep.subr.bf16.mxu1 %v3840_v12 }
  0xa3   :  { %2210 = vmatpush1.bf16.msra.mxu0 %v3835_v9 }
  0xa4   :  { %2211 = vmatprep.subr.bf16.mxu0 %v3843_v10  ;;  %2292 = vmatpush1.bf16.msra.mxu1 %v3838_v15  ;;  %v164_v15 = vlaneseq }
  0xa5   :  { %2293 = vmatprep.subr.bf16.mxu1 %v3846_v16 }
  0xa6   :  { %v4460_v16 = vshrl.u32 %v164_v15, 7  ;;  %v3940_v15 = vld [vmem:[#allocation4 + $0x3f8] ss:$28 sps:$4 sm:$0xff]  }
  0xa7   :  { %2212 = vmatpush1.bf16.msra.mxu0 %v3841_v13 }
  0xa8   :  { %2213 = vmatprep.subr.bf16.mxu0 %v3849_v14  ;;  %2294 = vmatpush1.bf16.msra.mxu1 %v3844_v19  ;;  %v170_v19 = vsub.s32 4, %v4460_v16 }
  0xa9   :  { %2295 = vmatprep.subr.bf16.mxu1 %v3852_v20  ;;  %v92_v20 = vld [vmem:[#allocation9 + $0x10] sm:$0xff] }
  0xab   :  { %2214 = vmatpush1.bf16.msra.mxu0 %v3847_v17  ;;  %v166_v17 = vsub.s32 0, %v4460_v16 }
  0xac   :  { %2215 = vmatprep.subr.bf16.mxu0 %v3855_v18  ;;  %2296 = vmatpush1.bf16.msra.mxu1 %v3850_v23  ;;  %v4463_v18 = vld [vmem:[#allocation9] sm:$0xff]  ;;  %v4468_v23 = vld [vmem:[#allocation9 + $0x8] sm:$0xff] }
  0xad   :  { %2297 = vmatprep.subr.bf16.mxu1 %v3858_v24  ;;  %v183_v24 = vrot.slane %v92_v20, %v166_v17 }
  0xaf   :  { %2216 = vmatpush1.bf16.msra.mxu0 %v3853_v21  ;;  %v167_v21 = vrot.slane %v4463_v18, %v166_v17 }
  0xb0   :  { %2217 = vmatprep.subr.bf16.mxu0 %v3861_v22  ;;  %2298 = vmatpush1.bf16.msra.mxu1 %v3856_v25  ;;  %v171_v22 = vrot.slane %v4463_v18, %v170_v19 }
  0xb1   :  { %2299 = vmatprep.subr.bf16.mxu1 %v3864_v26  ;;  %v207_v25 = vrot.slane %v167_v21, %v166_v17  ;;  %v175_v26 = vrot.slane %v4468_v23, %v166_v17  ;;  %v3946_v21 = vld [vmem:[#allocation4 + $0x430] ss:$28 sps:$4 sm:$0xff]  }
  0xb3   :  { %2218 = vmatpush1.bf16.msra.mxu0 %v3859_v6  ;;  %v187_v6 = vrot.slane %v92_v20, %v170_v19  ;;  %v3943_v20 = vld [vmem:[#allocation4 + $0x428] ss:$28 sps:$4 sm:$0xff]  }
  0xb4   :  { %2300 = vmatpush1.bf16.msra.mxu1 %v3862_v27  ;;  %2219 = vmatprep.subr.bf16.mxu0 %v3867_v28  ;;  %v211_v27 = vrot.slane %v171_v22, %v166_v17  ;;  %v179_v28 = vrot.slane %v4468_v23, %v170_v19  ;;  %v3951_v22 = vld [vmem:[#allocation4 + $0x464] ss:$28 sps:$4 sm:$0xff]  }
  0xb5   :  { %2301 = vmatprep.subr.bf16.mxu1 %v3870_v29  ;;  %v93_v29 = vld [vmem:[#allocation9 + $0x18] sm:$0xff] }
  0xb7   :  { %2220 = vmatpush1.bf16.msra.mxu0 %v3865_v30  ;;  %v223_v30 = vrot.slane %v183_v24, %v166_v17  ;;  %v3954_v24 = vld [vmem:[#allocation4 + $0x46c] ss:$28 sps:$4 sm:$0xff]  }
  0xb8   :  { %2302 = vmatpush1.bf16.msra.mxu1 %v3868_v31  ;;  %2221 = vmatprep.subr.bf16.mxu0 %v3873_v33  ;;  %v227_v31 = vrot.slane %v187_v6, %v166_v17  ;;  %v215_v33 = vrot.slane %v175_v26, %v166_v17  ;;  %v3949_v6 = vld [vmem:[#allocation4 + $0x460] ss:$28 sps:$4 sm:$0xff]  }
  0xb9   :  { %2303 = vmatprep.subr.bf16.mxu1 %v3876_v35  ;;  %v3957_v26 = vld [vmem:[#allocation4 + $0x49c] ss:$28 sps:$4 sm:$0xff]  }
  0xbb   :  { %2222 = vmatpush1.bf16.msra.mxu0 %v3871_v32 }
  0xbc   :  { %2304 = vmatpush1.bf16.msra.mxu1 %v3874_v34  ;;  %2223 = vmatprep.subr.bf16.mxu0 %v3879_v36  ;;  %v191_v34 = vrot.slane %v93_v29, %v166_v17 }
  0xbd   :  { %2305 = vmatprep.subr.bf16.mxu1 %v3882_v37  ;;  %v219_v37 = vrot.slane %v179_v28, %v166_v17  ;;  %v3955_v28 = vld [vmem:[#allocation4 + $0x498] ss:$28 sps:$4 sm:$0xff]  }
  0xbf   :  { %2224 = vmatpush1.bf16.msra.mxu0 %v3877_v38  ;;  %v195_v38 = vrot.slane %v93_v29, %v170_v19  ;;  %v3948_v19 = vld [vmem:[#allocation4 + $0x434] ss:$28 sps:$4 sm:$0xff]   ;;  %v3958_v29 = vld [vmem:[#allocation4 + $0x4a0] ss:$28 sps:$4 sm:$0xff]  }
  0xc0   :  { %2306 = vmatpush1.bf16.msra.mxu1 %v3880_v39  ;;  %2225 = vmatprep.subr.bf16.mxu0 %v3885_v40 }
  0xc1   :  { %2307 = vmatprep.subr.bf16.mxu1 %v3888_v41 }
  0xc3   :  { %2226 = vmatpush1.bf16.msra.mxu0 %v3883_v42 }
  0xc4   :  { %2308 = vmatpush1.bf16.msra.mxu1 %v3886_v43  ;;  %2227 = vmatprep.subr.bf16.mxu0 %v3891_v44 }
  0xc5   :  { %2309 = vmatprep.subr.bf16.mxu1 %v3894_v45 }
  0xc7   :  { %2228 = vmatpush1.bf16.msra.mxu0 %v3889_v0 }
  0xc8   :  { %2310 = vmatpush1.bf16.msra.mxu1 %v3892_v46  ;;  %2229 = vmatprep.subr.bf16.mxu0 %v3897_v47  ;;  %v231_v46 = vrot.slane %v191_v34, %v166_v17  ;;  %v3969_v34 = vld [vmem:[#allocation4 + $0x50c] ss:$28 sps:$4 sm:$0xff]  }
  0xc9   :  { %2311 = vmatprep.subr.bf16.mxu1 %v3900_v48 }
  0xcb   :  { %2230 = vmatpush1.bf16.msra.mxu0 %v3895_v49 }
  0xcc   :  { %2312 = vmatpush1.bf16.msra.mxu1 %v3898_v50  ;;  %2231 = vmatprep.subr.bf16.mxu0 %v3903_v51  ;;  %v235_v50 = vrot.slane %v195_v38, %v166_v17  ;;  %v3945_v17 = vld [vmem:[#allocation4 + $0x42c] ss:$28 sps:$4 sm:$0xff]   ;;  %v3975_v38 = vld [vmem:[#allocation4 + $0x544] ss:$28 sps:$4 sm:$0xff]  }
  0xcd   :  { %2313 = vmatprep.subr.bf16.mxu1 %v3906_v52 }
  0xcf   :  { %2232 = vmatpush1.bf16.msra.mxu0 %v3901_v53 }
  0xd0   :  { %2314 = vmatpush1.bf16.msra.mxu1 %v3904_v54  ;;  %2233 = vmatprep.subr.bf16.mxu0 %v3909_v55 }
  0xd1   :  { %2315 = vmatprep.subr.bf16.mxu1 %v3912_v56 }
  0xd3   :  { %2234 = vmatpush1.bf16.msra.mxu0 %v3907_v57 }
  0xd4   :  { %2316 = vmatpush1.bf16.msra.mxu1 %v3910_v58  ;;  %2235 = vmatprep.subr.bf16.mxu0 %v3915_v59  ;;  %v3925_v58 = vld [vmem:[#allocation4 + $0x380] ss:$28 sps:$4 sm:$0xff]   ;;  %v3928_v59 = vld [vmem:[#allocation4 + $0x388] ss:$28 sps:$4 sm:$0xff]  }
  0xd5   :  { %2317 = vmatprep.subr.bf16.mxu1 %v3918_v60 }
  0xd7   :  { %2236 = vmatpush1.bf16.msra.mxu0 %v3913_v61 }
  0xd8   :  { %2318 = vmatpush1.bf16.msra.mxu1 %v3916_v62  ;;  %2237 = vmatprep.subr.bf16.mxu0 %v3921_v63 }
  0xd9   :  { %2319 = vmatprep.subr.bf16.mxu1 %v3924_v1  ;;  %v3933_v1 = vld [vmem:[#allocation4 + $0x3bc] ss:$28 sps:$4 sm:$0xff]  }
  0xdb   :  { %2238 = vmatpush1.bf16.msra.mxu0 %v3919_v2  ;;  %v3936_v2 = vld [vmem:[#allocation4 + $0x3c4] ss:$28 sps:$4 sm:$0xff]  }
  0xdc   :  { %2320 = vmatpush1.bf16.msra.mxu1 %v3922_v3  ;;  %2248 = vmatprep.subr.bf16.mxu0 %v3927_v4 }
  0xdd   :  { %2330 = vmatprep.subr.bf16.mxu1 %v3930_v5 }
 0x151   :  { %v590_v7 = vpop.f32.mrb[0].mxu0  ;;  %v631_v11 = vpop.f32.mrb[0].mxu1 }
 0x152   :  { %v592_v8 = vpop.f32.mrb[1].mxu0  ;;  %v633_v12 = vpop.f32.mrb[1].mxu1  ;;  %v591_v32 = vadd.f32 %v590_v7, %v207_v25  ;;  %v632_v45 = vadd.f32 %v631_v11, %v215_v33  ;;  %v3939_v11 = vld [vmem:[#allocation4 + $0x3f4] ss:$28 sps:$4 sm:$0xff]   ;;  %v3952_v25 = vld [vmem:[#allocation4 + $0x468] ss:$28 sps:$4 sm:$0xff]  }
 0x153   :  { %v594_v9 = vpop.f32.mrb[2].mxu0  ;;  %v635_v13 = vpop.f32.mrb[2].mxu1  ;;  %v593_v35 = vadd.f32 %v592_v8, %v211_v27  ;;  %v634_v49 = vadd.f32 %v633_v12, %v219_v37  ;;  %v3931_v8 = vld [vmem:[#allocation4 + $0x3b8] ss:$28 sps:$4 sm:$0xff]   ;;  %v3960_v27 = vld [vmem:[#allocation4 + $0x4a4] ss:$28 sps:$4 sm:$0xff]  }
 0x154   :  { %v595_v10 = vpop.f32.mrb[3].mxu0  ;;  %v636_v14 = vpop.f32.mrb[3].mxu1  ;;  %v720_v43 = vmax.f32 %v591_v32, 0.0  ;;  %v722_v54 = vmax.f32 %v632_v45, 0.0  ;;  %v3934_v9 = vld [vmem:[#allocation4 + $0x3c0] ss:$28 sps:$4 sm:$0xff]  }
 0x155   :  { %v721_v47 = vmax.f32 %v593_v35, 0.0  ;;  %v723_v60 = vmax.f32 %v634_v49, 0.0  ;;  %v3942_v12 = vld [vmem:[#allocation4 + $0x3fc] ss:$28 sps:$4 sm:$0xff]   ;;  %v3937_v14 = vld [vmem:[#allocation4 + $0x3f0] ss:$28 sps:$4 sm:$0xff]  }
 0x156   :  { %v3961_v32 = vld [vmem:[#allocation4 + $0x4d0] ss:$28 sps:$4 sm:$0xff]   ;;  %v3964_v33 = vld [vmem:[#allocation4 + $0x4d8] ss:$28 sps:$4 sm:$0xff]  }
 0x157   :  { %v3972_v35 = vld [vmem:[#allocation4 + $0x514] ss:$28 sps:$4 sm:$0xff]   ;;  %v3993_v49 = vld [vmem:[#allocation4 + $0x5ec] ss:$28 sps:$4 sm:$0xff]  }
 0x158   :  { %v3970_v37 = vld [vmem:[#allocation4 + $0x510] ss:$28 sps:$4 sm:$0xff]  }
 0x159   :  { %v3987_v45 = vld [vmem:[#allocation4 + $0x5b4] ss:$28 sps:$4 sm:$0xff]  }
 0x171   :  { %v672_v36 = vpop.f32.mrb[4].mxu0 }
 0x172   :  { %v673_v39 = vadd.f32 %v672_v36, %v223_v30  ;;  %v674_v40 = vpop.f32.mrb[5].mxu0  ;;  %v713_v53 = vpop.f32.mrb[4].mxu1  ;;  %v3963_v30 = vld [vmem:[#allocation4 + $0x4d4] ss:$28 sps:$4 sm:$0xff]   ;;  %v3967_v36 = vld [vmem:[#allocation4 + $0x508] ss:$28 sps:$4 sm:$0xff]  }
 0x173   :  { %v675_v41 = vadd.f32 %v674_v40, %v227_v31  ;;  %v676_v42 = vpop.f32.mrb[6].mxu0  ;;  %v714_v55 = vadd.f32 %v713_v53, %v231_v46  ;;  %v715_v56 = vpop.f32.mrb[5].mxu1  ;;  %v3966_v31 = vld [vmem:[#allocation4 + $0x4dc] ss:$28 sps:$4 sm:$0xff]   ;;  %v3999_v53 = vld [vmem:[#allocation4 + $0x624] ss:$28 sps:$4 sm:$0xff]  }
 0x174   :  { %v724_v44 = vmax.f32 %v673_v39, 0.0  ;;  %v677_v0 = vpop.f32.mrb[7].mxu0  ;;  %v716_v61 = vadd.f32 %v715_v56, %v235_v50  ;;  %v717_v62 = vpop.f32.mrb[6].mxu1  ;;  %v3978_v39 = vld [vmem:[#allocation4 + $0x54c] ss:$28 sps:$4 sm:$0xff]  }
 0x175   :  { %v725_v48 = vmax.f32 %v675_v41, 0.0  ;;  %v726_v3 = vmax.f32 %v714_v55, 0.0  ;;  %v718_v4 = vpop.f32.mrb[7].mxu1  ;;  %v3973_v40 = vld [vmem:[#allocation4 + $0x540] ss:$28 sps:$4 sm:$0xff]  }
 0x176   :  { %v728_v51 = vmax.f32 %v720_v43, %v724_v44  ;;  %v727_v5 = vmax.f32 %v716_v61, 0.0  ;;  %v3976_v41 = vld [vmem:[#allocation4 + $0x548] ss:$28 sps:$4 sm:$0xff]   ;;  %v3981_v42 = vld [vmem:[#allocation4 + $0x57c] ss:$28 sps:$4 sm:$0xff]  }
 0x177   :  { %v729_v52 = vmax.f32 %v721_v47, %v725_v48  ;;  %v4480_v7 = vmax.f32 %v722_v54, %v726_v3  ;;  %v3984_v43 = vld [vmem:[#allocation4 + $0x584] ss:$28 sps:$4 sm:$0xff]   ;;  %v3979_v44 = vld [vmem:[#allocation4 + $0x578] ss:$28 sps:$4 sm:$0xff]   ;;  %v3985_v47 = vld [vmem:[#allocation4 + $0x5b0] ss:$28 sps:$4 sm:$0xff]  }
 0x178   :  { %v4474_v63 = vpack.c.bf16 %v728_v51, %v728_v51  ;;  %v731_v10 = vmax.f32 %v723_v60, %v727_v5  ;;  %v3982_v0 = vld [vmem:[#allocation4 + $0x580] ss:$28 sps:$4 sm:$0xff]   ;;  %v3988_v48 = vld [vmem:[#allocation4 + $0x5b8] ss:$28 sps:$4 sm:$0xff]   ;;  %v3991_v51 = vld [vmem:[#allocation4 + $0x5e8] ss:$28 sps:$4 sm:$0xff]  }
 0x179   :  { %v4472_v57 = vpack.c.bf16 %v729_v52, %v729_v52  ;;  %v3990_v46 = vld [vmem:[#allocation4 + $0x5bc] ss:$28 sps:$4 sm:$0xff]   ;;  %v3996_v50 = vld [vmem:[#allocation4 + $0x5f4] ss:$28 sps:$4 sm:$0xff]   ;;  %v4002_v54 = vld [vmem:[#allocation4 + $0x62c] ss:$28 sps:$4 sm:$0xff]  }
 0x17a   :  { %v4482_v13 = vpack.c.bf16 %v731_v10, %v731_v10  ;;  %v3994_v52 = vld [vmem:[#allocation4 + $0x5f0] ss:$28 sps:$4 sm:$0xff]   ;;  %v3997_v55 = vld [vmem:[#allocation4 + $0x620] ss:$28 sps:$4 sm:$0xff]   ;;  %v4000_v56 = vld [vmem:[#allocation4 + $0x628] ss:$28 sps:$4 sm:$0xff]  }
 0x17b   :  { %2239 = vmatprep.mubr.bf16.mxu0 %v4472_v57  ;;  %2321 = vmatprep.mubr.bf16.mxu1 %v4472_v57  ;;  %v4003_v60 = vld [vmem:[#allocation4 + $0x658] ss:$28 sps:$4 sm:$0xff]   ;;  %v4006_v61 = vld [vmem:[#allocation4 + $0x660] ss:$28 sps:$4 sm:$0xff]   ;;  %v4017_v4 = vld [vmem:[#allocation4 + $0x6cc] ss:$28 sps:$4 sm:$0xff]  }
 0x17c   :  { %2240 = vmatmul.mubr.bf16.vlgmr.msra.gmra.mrb[8].mxu0 %v4474_v63  ;;  %2322 = vmatmul.mubr.bf16.vlgmr.msra.gmra.mrb[8].mxu1 %v4474_v63  ;;  %v4011_v62 = vld [vmem:[#allocation4 + $0x694] ss:$28 sps:$4 sm:$0xff]  }
 0x17d   :  { %2249 = vmatpush1.bf16.msra.mxu0 %v3925_v58  ;;  %2331 = vmatpush1.bf16.msra.mxu1 %v3928_v59  ;;  %v4005_v58 = vld [vmem:[#allocation4 + $0x65c] ss:$28 sps:$4 sm:$0xff]   ;;  %v4008_v59 = vld [vmem:[#allocation4 + $0x664] ss:$28 sps:$4 sm:$0xff]   ;;  %v4020_v5 = vld [vmem:[#allocation4 + $0x6d4] ss:$28 sps:$4 sm:$0xff]  }
 0x17e   :  { %2250 = vmatprep.subr.bf16.mxu0 %v3933_v1  ;;  %2332 = vmatprep.subr.bf16.mxu1 %v3936_v2  ;;  %v4014_v1 = vld [vmem:[#allocation4 + $0x69c] ss:$28 sps:$4 sm:$0xff]   ;;  %v4009_v2 = vld [vmem:[#allocation4 + $0x690] ss:$28 sps:$4 sm:$0xff]  }
 0x17f   :  { %2280 = vmatprep.mubr.bf16.mxu0 %v4482_v13  ;;  %2362 = vmatprep.mubr.bf16.mxu1 %v4482_v13  ;;  %v4012_v3 = vld [vmem:[#allocation4 + $0x698] ss:$28 sps:$4 sm:$0xff]  }
 0x180   :  { %v4023_v10 = vld [vmem:[#allocation4 + $0x14] ss:$28 sps:$4 sm:$0xff]  }
 0x181   :  { %2251 = vmatpush1.bf16.msra.mxu0 %v3931_v8  ;;  %2333 = vmatpush1.bf16.msra.mxu1 %v3934_v9  ;;  %v4015_v8 = vld [vmem:[#allocation4 + $0x6c8] ss:$28 sps:$4 sm:$0xff]   ;;  %v4018_v9 = vld [vmem:[#allocation4 + $0x6d0] ss:$28 sps:$4 sm:$0xff]  }
 0x182   :  { %2252 = vmatprep.subr.bf16.mxu0 %v3939_v11  ;;  %2334 = vmatprep.subr.bf16.mxu1 %v3942_v12  ;;  %v4024_v11 = vld [vmem:[#allocation4 + $0x1d8] ss:$28 sps:$4 sm:$0xff]   ;;  %v4021_v12 = vld [vmem:[#allocation4 + $0x10] ss:$28 sps:$4 sm:$0xff]  }
 0x185   :  { %2253 = vmatpush1.bf16.msra.mxu0 %v3937_v14  ;;  %2335 = vmatpush1.bf16.msra.mxu1 %v3940_v15  ;;  %v4488_v14 = vpack.c.bf16 %v4480_v7, %v4480_v7  ;;  %v4025_v15 = vld [vmem:[#allocation4 + $0x18] ss:$28 sps:$4 sm:$0xff]   ;;  %v4034_v7 = vld [vmem:[#allocation4 + $0x248] ss:$28 sps:$4 sm:$0xff]  }
 0x186   :  { %2254 = vmatprep.subr.bf16.mxu0 %v3945_v17  ;;  %2336 = vmatprep.subr.bf16.mxu1 %v3948_v19  ;;  %v4028_v17 = vld [vmem:[#allocation4 + $0x4c] ss:$28 sps:$4 sm:$0xff]  }
 0x187   :  { %v4029_v19 = vld [vmem:[#allocation4 + $0x210] ss:$28 sps:$4 sm:$0xff]  }
 0x189   :  { %2255 = vmatpush1.bf16.msra.mxu0 %v3943_v20  ;;  %2337 = vmatpush1.bf16.msra.mxu1 %v3946_v21  ;;  %v4026_v20 = vld [vmem:[#allocation4 + $0x48] ss:$28 sps:$4 sm:$0xff]   ;;  %v4030_v21 = vld [vmem:[#allocation4 + $0x50] ss:$28 sps:$4 sm:$0xff]  }
 0x18a   :  { %2256 = vmatprep.subr.bf16.mxu0 %v3951_v22  ;;  %2338 = vmatprep.subr.bf16.mxu1 %v3954_v24  ;;  %v4033_v22 = vld [vmem:[#allocation4 + $0x84] ss:$28 sps:$4 sm:$0xff]  }
 0x18b   :  { %v4031_v24 = vld [vmem:[#allocation4 + $0x80] ss:$28 sps:$4 sm:$0xff]  }
 0x18d   :  { %2257 = vmatpush1.bf16.msra.mxu0 %v3949_v6  ;;  %2339 = vmatpush1.bf16.msra.mxu1 %v3952_v25  ;;  %v4035_v6 = vld [vmem:[#allocation4 + $0x88] ss:$28 sps:$4 sm:$0xff]   ;;  %v4038_v25 = vld [vmem:[#allocation4 + $0xbc] ss:$28 sps:$4 sm:$0xff]  }
 0x18e   :  { %2258 = vmatprep.subr.bf16.mxu0 %v3957_v26  ;;  %2340 = vmatprep.subr.bf16.mxu1 %v3960_v27  ;;  %v4039_v26 = vld [vmem:[#allocation4 + $0x280] ss:$28 sps:$4 sm:$0xff]   ;;  %v4036_v27 = vld [vmem:[#allocation4 + $0xb8] ss:$28 sps:$4 sm:$0xff]  }
 0x191   :  { %2259 = vmatpush1.bf16.msra.mxu0 %v3955_v28  ;;  %2341 = vmatpush1.bf16.msra.mxu1 %v3958_v29  ;;  %v4040_v28 = vld [vmem:[#allocation4 + $0xc0] ss:$28 sps:$4 sm:$0xff]   ;;  %v4043_v29 = vld [vmem:[#allocation4 + $0xf4] ss:$28 sps:$4 sm:$0xff]  }
 0x192   :  { %2260 = vmatprep.subr.bf16.mxu0 %v3963_v30  ;;  %2342 = vmatprep.subr.bf16.mxu1 %v3966_v31  ;;  %v4041_v30 = vld [vmem:[#allocation4 + $0xf0] ss:$28 sps:$4 sm:$0xff]   ;;  %v4045_v31 = vld [vmem:[#allocation4 + $0xf8] ss:$28 sps:$4 sm:$0xff]  }
 0x195   :  { %2261 = vmatpush1.bf16.msra.mxu0 %v3961_v32  ;;  %2343 = vmatpush1.bf16.msra.mxu1 %v3964_v33  ;;  %v4048_v32 = vld [vmem:[#allocation4 + $0x12c] ss:$28 sps:$4 sm:$0xff]  }
 0x196   :  { %2262 = vmatprep.subr.bf16.mxu0 %v3969_v34  ;;  %2344 = vmatprep.subr.bf16.mxu1 %v3972_v35  ;;  %v4049_v33 = vld [vmem:[#allocation4 + $0x2f0] ss:$28 sps:$4 sm:$0xff]   ;;  %v4046_v34 = vld [vmem:[#allocation4 + $0x128] ss:$28 sps:$4 sm:$0xff]  }
 0x197   :  { %v4050_v35 = vld [vmem:[#allocation4 + $0x130] ss:$28 sps:$4 sm:$0xff]  }
 0x199   :  { %2263 = vmatpush1.bf16.msra.mxu0 %v3967_v36  ;;  %2345 = vmatpush1.bf16.msra.mxu1 %v3970_v37  ;;  %v4053_v36 = vld [vmem:[#allocation4 + $0x164] ss:$28 sps:$4 sm:$0xff]  }
 0x19a   :  { %2264 = vmatprep.subr.bf16.mxu0 %v3975_v38  ;;  %2346 = vmatprep.subr.bf16.mxu1 %v3978_v39  ;;  %v4054_v37 = vld [vmem:[#allocation4 + $0x328] ss:$28 sps:$4 sm:$0xff]   ;;  %v4051_v38 = vld [vmem:[#allocation4 + $0x160] ss:$28 sps:$4 sm:$0xff]  }
 0x19b   :  { %v4055_v39 = vld [vmem:[#allocation4 + $0x168] ss:$28 sps:$4 sm:$0xff]  }
 0x19d   :  { %2265 = vmatpush1.bf16.msra.mxu0 %v3973_v40  ;;  %2347 = vmatpush1.bf16.msra.mxu1 %v3976_v41  ;;  %v4058_v40 = vld [vmem:[#allocation4 + $0x19c] ss:$28 sps:$4 sm:$0xff]  }
 0x19e   :  { %2266 = vmatprep.subr.bf16.mxu0 %v3981_v42  ;;  %2348 = vmatprep.subr.bf16.mxu1 %v3984_v43  ;;  %v4059_v41 = vld [vmem:[#allocation4 + $0x360] ss:$28 sps:$4 sm:$0xff]   ;;  %v4056_v42 = vld [vmem:[#allocation4 + $0x198] ss:$28 sps:$4 sm:$0xff]  }
 0x19f   :  { %v4060_v43 = vld [vmem:[#allocation4 + $0x1a0] ss:$28 sps:$4 sm:$0xff]  }
 0x1a1   :  { %2267 = vmatpush1.bf16.msra.mxu0 %v3979_v44  ;;  %2349 = vmatpush1.bf16.msra.mxu1 %v3982_v0  ;;  %v4063_v44 = vld [vmem:[#allocation4 + $0x1d4] ss:$28 sps:$4 sm:$0xff]  }
 0x1a2   :  { %2268 = vmatprep.subr.bf16.mxu0 %v3987_v45  ;;  %2350 = vmatprep.subr.bf16.mxu1 %v3990_v46  ;;  %v4064_v0 = vld [vmem:[#allocation4 + $0x558] ss:$28 sps:$4 sm:$0xff]   ;;  %v4061_v45 = vld [vmem:[#allocation4 + $0x1d0] ss:$28 sps:$4 sm:$0xff]  }
 0x1a3   :  { %v4065_v46 = vld [vmem:[#allocation4 + $0x398] ss:$28 sps:$4 sm:$0xff]  }
 0x1a5   :  { %2269 = vmatpush1.bf16.msra.mxu0 %v3985_v47  ;;  %2351 = vmatpush1.bf16.msra.mxu1 %v3988_v48  ;;  %v4068_v47 = vld [vmem:[#allocation4 + $0x20c] ss:$28 sps:$4 sm:$0xff]  }
 0x1a6   :  { %2270 = vmatprep.subr.bf16.mxu0 %v3993_v49  ;;  %2352 = vmatprep.subr.bf16.mxu1 %v3996_v50  ;;  %v4069_v48 = vld [vmem:[#allocation4 + $0x590] ss:$28 sps:$4 sm:$0xff]   ;;  %v4066_v49 = vld [vmem:[#allocation4 + $0x208] ss:$28 sps:$4 sm:$0xff]  }
 0x1a7   :  { %v4070_v50 = vld [vmem:[#allocation4 + $0x3d0] ss:$28 sps:$4 sm:$0xff]  }
 0x1a9   :  { %2271 = vmatpush1.bf16.msra.mxu0 %v3991_v51  ;;  %2353 = vmatpush1.bf16.msra.mxu1 %v3994_v52  ;;  %v4073_v51 = vld [vmem:[#allocation4 + $0x244] ss:$28 sps:$4 sm:$0xff]  }
 0x1aa   :  { %2272 = vmatprep.subr.bf16.mxu0 %v3999_v53  ;;  %2354 = vmatprep.subr.bf16.mxu1 %v4002_v54  ;;  %v4074_v52 = vld [vmem:[#allocation4 + $0x5c8] ss:$28 sps:$4 sm:$0xff]   ;;  %v4071_v53 = vld [vmem:[#allocation4 + $0x240] ss:$28 sps:$4 sm:$0xff]  }
 0x1ab   :  { %v4075_v54 = vld [vmem:[#allocation4 + $0x408] ss:$28 sps:$4 sm:$0xff]  }
 0x1ad   :  { %2273 = vmatpush1.bf16.msra.mxu0 %v3997_v55  ;;  %2355 = vmatpush1.bf16.msra.mxu1 %v4000_v56  ;;  %v4078_v55 = vld [vmem:[#allocation4 + $0x27c] ss:$28 sps:$4 sm:$0xff]  }
 0x1ae   :  { %2274 = vmatprep.subr.bf16.mxu0 %v4005_v58  ;;  %2356 = vmatprep.subr.bf16.mxu1 %v4008_v59  ;;  %v4079_v56 = vld [vmem:[#allocation4 + $0x600] ss:$28 sps:$4 sm:$0xff]   ;;  %v4076_v58 = vld [vmem:[#allocation4 + $0x278] ss:$28 sps:$4 sm:$0xff]  }
 0x1af   :  { %v4080_v59 = vld [vmem:[#allocation4 + $0x440] ss:$28 sps:$4 sm:$0xff]  }
 0x1b1   :  { %2275 = vmatpush1.bf16.msra.mxu0 %v4003_v60  ;;  %2357 = vmatpush1.bf16.msra.mxu1 %v4006_v61  ;;  %v4083_v60 = vld [vmem:[#allocation4 + $0x2b4] ss:$28 sps:$4 sm:$0xff]  }
 0x1b2   :  { %2276 = vmatprep.subr.bf16.mxu0 %v4011_v62  ;;  %2358 = vmatprep.subr.bf16.mxu1 %v4014_v1  ;;  %v4084_v61 = vld [vmem:[#allocation4 + $0x638] ss:$28 sps:$4 sm:$0xff]   ;;  %v4081_v62 = vld [vmem:[#allocation4 + $0x2b0] ss:$28 sps:$4 sm:$0xff]  }
 0x1b3   :  { %v4085_v1 = vld [vmem:[#allocation4 + $0x478] ss:$28 sps:$4 sm:$0xff]  }
 0x1b5   :  { %2277 = vmatpush1.bf16.msra.mxu0 %v4009_v2  ;;  %2359 = vmatpush1.bf16.msra.mxu1 %v4012_v3  ;;  %v4088_v2 = vld [vmem:[#allocation4 + $0x2ec] ss:$28 sps:$4 sm:$0xff]  }
 0x1b6   :  { %2278 = vmatprep.subr.bf16.mxu0 %v4017_v4  ;;  %2360 = vmatprep.subr.bf16.mxu1 %v4020_v5  ;;  %v4089_v3 = vld [vmem:[#allocation4 + $0x670] ss:$28 sps:$4 sm:$0xff]   ;;  %v4086_v4 = vld [vmem:[#allocation4 + $0x2e8] ss:$28 sps:$4 sm:$0xff]  }
 0x1b7   :  { %v4090_v5 = vld [vmem:[#allocation4 + $0x4b0] ss:$28 sps:$4 sm:$0xff]  }
 0x1b9   :  { %2279 = vmatpush1.bf16.msra.mxu0 %v4015_v8  ;;  %2361 = vmatpush1.bf16.msra.mxu1 %v4018_v9  ;;  %v4093_v8 = vld [vmem:[#allocation4 + $0x324] ss:$28 sps:$4 sm:$0xff]  }
 0x1ba   :  { %2371 = vmatprep.subr.bf16.mxu0 %v4023_v10  ;;  %3629 = vmatprep.subr.bf16.mxu1 %v4024_v11  ;;  %v4094_v9 = vld [vmem:[#allocation4 + $0x6a8] ss:$28 sps:$4 sm:$0xff]   ;;  %v4091_v10 = vld [vmem:[#allocation4 + $0x320] ss:$28 sps:$4 sm:$0xff]  }
 0x1bb   :  { %v4095_v11 = vld [vmem:[#allocation4 + $0x4e8] ss:$28 sps:$4 sm:$0xff]  }
 0x1bc   :  { %2281 = vmatmul.mubr.bf16.vlgmr.msra.gmra.mrb[8].mxu0 %v4488_v14  ;;  %2363 = vmatmul.mubr.bf16.vlgmr.msra.gmra.mrb[8].mxu1 %v4488_v14 }
 0x1bd   :  { %2372 = vmatpush1.bf16.msra.mxu0 %v4021_v12  ;;  %2403 = vmatprep.mubr.bf16.mxu0 %v4472_v57  ;;  %v4098_v12 = vld [vmem:[#allocation4 + $0x35c] ss:$28 sps:$4 sm:$0xff]  }
 0x1be   :  { %3630 = vmatpush3.bf16.msra.mxu1 %v4025_v15  ;;  %2485 = vmatprep.mubr.bf16.mxu1 %v4472_v57  ;;  %v4044_v57 = vld [vmem:[#allocation4 + $0x2b8] ss:$28 sps:$4 sm:$0xff]   ;;  %v4099_v15 = vld [vmem:[#allocation4 + $0x6e0] ss:$28 sps:$4 sm:$0xff]  }
 0x1bf   :  { %2373 = vmatprep.subr.bf16.mxu0 %v4028_v17  ;;  %3631 = vmatprep.subr.bf16.mxu1 %v4029_v19  ;;  %v4096_v17 = vld [vmem:[#allocation4 + $0x358] ss:$28 sps:$4 sm:$0xff]   ;;  %v4100_v19 = vld [vmem:[#allocation4 + $0x520] ss:$28 sps:$4 sm:$0xff]  }
 0x1c1   :  { %2374 = vmatpush1.bf16.msra.mxu0 %v4026_v20  ;;  %v4103_v20 = vld [vmem:[#allocation4 + $0x394] ss:$28 sps:$4 sm:$0xff]  }
 0x1c2   :  { %3632 = vmatpush3.bf16.msra.mxu1 %v4030_v21  ;;  %2375 = vmatprep.subr.bf16.mxu0 %v4033_v22  ;;  %v4149_v21 = vld [vmem:[#allocation6 + $0x40] sm:$0xff]   ;;  %v4101_v22 = vld [vmem:[#allocation4 + $0x390] ss:$28 sps:$4 sm:$0xff]  }
 0x1c3   :  { %3633 = vmatprep.subr.bf16.mxu1 %v4034_v7  ;;  %v4106_v7 = vld [vmem:[#allocation4 + $0x3cc] ss:$28 sps:$4 sm:$0xff]  }
 0x1c5   :  { %2376 = vmatpush1.bf16.msra.mxu0 %v4031_v24  ;;  %v4150_v24 = vld [vmem:[#allocation6] sm:$0xff]  }
 0x1c6   :  { %3634 = vmatpush3.bf16.msra.mxu1 %v4035_v6  ;;  %2377 = vmatprep.subr.bf16.mxu0 %v4038_v25  ;;  %v4151_v6 = vld [vmem:[#allocation6 + $0x48] sm:$0xff]  }
 0x1c7   :  { %3635 = vmatprep.subr.bf16.mxu1 %v4039_v26  ;;  %v4104_v25 = vld [vmem:[#allocation4 + $0x3c8] ss:$28 sps:$4 sm:$0xff]  }
 0x1c8   :  { %v4109_v26 = vld [vmem:[#allocation4 + $0x404] ss:$28 sps:$4 sm:$0xff]  }
 0x1c9   :  { %2378 = vmatpush1.bf16.msra.mxu0 %v4036_v27  ;;  %v4152_v27 = vld [vmem:[#allocation6 + $0x8] sm:$0xff]  }
 0x1ca   :  { %3636 = vmatpush3.bf16.msra.mxu1 %v4040_v28  ;;  %2379 = vmatprep.subr.bf16.mxu0 %v4043_v29  ;;  %v4153_v28 = vld [vmem:[#allocation6 + $0x50] sm:$0xff]   ;;  %v4107_v29 = vld [vmem:[#allocation4 + $0x400] ss:$28 sps:$4 sm:$0xff]  }
 0x1cb   :  { %3637 = vmatprep.subr.bf16.mxu1 %v4044_v57  ;;  %v4112_v57 = vld [vmem:[#allocation4 + $0x43c] ss:$28 sps:$4 sm:$0xff]  }
 0x1cd   :  { %2380 = vmatpush1.bf16.msra.mxu0 %v4041_v30  ;;  %v4154_v30 = vld [vmem:[#allocation6 + $0x10] sm:$0xff]  }
 0x1ce   :  { %3638 = vmatpush3.bf16.msra.mxu1 %v4045_v31  ;;  %2381 = vmatprep.subr.bf16.mxu0 %v4048_v32  ;;  %v4110_v31 = vld [vmem:[#allocation4 + $0x438] ss:$28 sps:$4 sm:$0xff]  }
 0x1cf   :  { %3639 = vmatprep.subr.bf16.mxu1 %v4049_v33  ;;  %v4115_v32 = vld [vmem:[#allocation4 + $0x474] ss:$28 sps:$4 sm:$0xff]   ;;  %v4157_v33 = vld [vmem:[#allocation6 + $0x60] sm:$0xff]  }
 0x1d1   :  { %2382 = vmatpush1.bf16.msra.mxu0 %v4046_v34  ;;  %v4113_v34 = vld [vmem:[#allocation4 + $0x470] ss:$28 sps:$4 sm:$0xff]  }
 0x1d2   :  { %3640 = vmatpush3.bf16.msra.mxu1 %v4050_v35  ;;  %2383 = vmatprep.subr.bf16.mxu0 %v4053_v36  ;;  %v4118_v35 = vld [vmem:[#allocation4 + $0x4ac] ss:$28 sps:$4 sm:$0xff]   ;;  %v4158_v36 = vld [vmem:[#allocation6 + $0x20] sm:$0xff]  }
 0x1d3   :  { %3641 = vmatprep.subr.bf16.mxu1 %v4054_v37  ;;  %v4159_v37 = vld [vmem:[#allocation6 + $0x68] sm:$0xff]  }
 0x1d5   :  { %2384 = vmatpush1.bf16.msra.mxu0 %v4051_v38  ;;  %v4116_v38 = vld [vmem:[#allocation4 + $0x4a8] ss:$28 sps:$4 sm:$0xff]  }
 0x1d6   :  { %3642 = vmatpush3.bf16.msra.mxu1 %v4055_v39  ;;  %2385 = vmatprep.subr.bf16.mxu0 %v4058_v40  ;;  %v4121_v39 = vld [vmem:[#allocation4 + $0x4e4] ss:$28 sps:$4 sm:$0xff]   ;;  %v4160_v40 = vld [vmem:[#allocation6 + $0x28] sm:$0xff]  }
 0x1d7   :  { %3643 = vmatprep.subr.bf16.mxu1 %v4059_v41  ;;  %v4161_v41 = vld [vmem:[#allocation6 + $0x70] sm:$0xff]  }
 0x1d9   :  { %2386 = vmatpush1.bf16.msra.mxu0 %v4056_v42  ;;  %v4119_v42 = vld [vmem:[#allocation4 + $0x4e0] ss:$28 sps:$4 sm:$0xff]  }
 0x1da   :  { %3644 = vmatpush3.bf16.msra.mxu1 %v4060_v43  ;;  %2387 = vmatprep.subr.bf16.mxu0 %v4063_v44  ;;  %v4124_v43 = vld [vmem:[#allocation4 + $0x51c] ss:$28 sps:$4 sm:$0xff]   ;;  %v4162_v44 = vld [vmem:[#allocation6 + $0x30] sm:$0xff]  }
 0x1db   :  { %3651 = vmatprep.subr.bf16.mxu1 %v4064_v0  ;;  %v4163_v0 = vld [vmem:[#allocation6 + $0x78] sm:$0xff]  }
 0x1dd   :  { %2486 = vmatmul.mubr.bf16.vlgmr.msra.gmra.mrb[12].mxu1 %v4474_v63  ;;  %2388 = vmatpush1.bf16.msra.mxu0 %v4061_v45  ;;  %v4122_v45 = vld [vmem:[#allocation4 + $0x518] ss:$28 sps:$4 sm:$0xff]  }
 0x1de   :  { %3652 = vmatpush3.bf16.msra.mxu1 %v4065_v46  ;;  %2525 = vmatprep.mubr.bf16.mxu1 %v4482_v13  ;;  %v4127_v46 = vld [vmem:[#allocation4 + $0x554] ss:$28 sps:$4 sm:$0xff]  }
 0x1df   :  { %2389 = vmatprep.subr.bf16.mxu0 %v4068_v47  ;;  %3653 = vmatprep.subr.bf16.mxu1 %v4069_v48  ;;  %v4164_v47 = vld [vmem:[#allocation6 + $0x38] sm:$0xff]   ;;  %v4165_v48 = vld [vmem:[#allocation6 + $0xc0] sm:$0xff]  }
 0x1e1   :  { %2390 = vmatpush1.bf16.msra.mxu0 %v4066_v49  ;;  %v4125_v49 = vld [vmem:[#allocation4 + $0x550] ss:$28 sps:$4 sm:$0xff]  }
 0x1e2   :  { %3654 = vmatpush3.bf16.msra.mxu1 %v4070_v50  ;;  %2391 = vmatprep.subr.bf16.mxu0 %v4073_v51  ;;  %v4130_v50 = vld [vmem:[#allocation4 + $0x58c] ss:$28 sps:$4 sm:$0xff]  }
 0x1e3   :  { %3655 = vmatprep.subr.bf16.mxu1 %v4074_v52  ;;  %v4128_v51 = vld [vmem:[#allocation4 + $0x588] ss:$28 sps:$4 sm:$0xff]  }
 0x1e4   :  { %v4133_v52 = vld [vmem:[#allocation4 + $0x5c4] ss:$28 sps:$4 sm:$0xff]  }
 0x1e5   :  { %2392 = vmatpush1.bf16.msra.mxu0 %v4071_v53  ;;  %v4131_v53 = vld [vmem:[#allocation4 + $0x5c0] ss:$28 sps:$4 sm:$0xff]  }
 0x1e6   :  { %3656 = vmatpush3.bf16.msra.mxu1 %v4075_v54  ;;  %2393 = vmatprep.subr.bf16.mxu0 %v4078_v55  ;;  %v4136_v54 = vld [vmem:[#allocation4 + $0x5fc] ss:$28 sps:$4 sm:$0xff]  }
 0x1e7   :  { %3657 = vmatprep.subr.bf16.mxu1 %v4079_v56  ;;  %v4134_v55 = vld [vmem:[#allocation4 + $0x5f8] ss:$28 sps:$4 sm:$0xff]  }
 0x1e8   :  { %v4139_v56 = vld [vmem:[#allocation4 + $0x634] ss:$28 sps:$4 sm:$0xff]  }
 0x1e9   :  { %2394 = vmatpush1.bf16.msra.mxu0 %v4076_v58  ;;  %v4137_v58 = vld [vmem:[#allocation4 + $0x630] ss:$28 sps:$4 sm:$0xff]  }
 0x1ea   :  { %3658 = vmatpush3.bf16.msra.mxu1 %v4080_v59  ;;  %2395 = vmatprep.subr.bf16.mxu0 %v4083_v60  ;;  %v4142_v59 = vld [vmem:[#allocation4 + $0x66c] ss:$28 sps:$4 sm:$0xff]  }
 0x1eb   :  { %3659 = vmatprep.subr.bf16.mxu1 %v4084_v61  ;;  %v4140_v60 = vld [vmem:[#allocation4 + $0x668] ss:$28 sps:$4 sm:$0xff]  }
 0x1ec   :  { %v4145_v61 = vld [vmem:[#allocation4 + $0x6a4] ss:$28 sps:$4 sm:$0xff]  }
 0x1ed   :  { %2396 = vmatpush1.bf16.msra.mxu0 %v4081_v62  ;;  %v4143_v62 = vld [vmem:[#allocation4 + $0x6a0] ss:$28 sps:$4 sm:$0xff]  }
 0x1ee   :  { %3660 = vmatpush3.bf16.msra.mxu1 %v4085_v1  ;;  %2397 = vmatprep.subr.bf16.mxu0 %v4088_v2  ;;  %v4148_v1 = vld [vmem:[#allocation4 + $0x6dc] ss:$28 sps:$4 sm:$0xff]  }
 0x1ef   :  { %3661 = vmatprep.subr.bf16.mxu1 %v4089_v3  ;;  %v4146_v2 = vld [vmem:[#allocation4 + $0x6d8] ss:$28 sps:$4 sm:$0xff]   ;;  %v4189_v3 = vld [vmem:[#allocation6 + $0x140] sm:$0xff]  }
 0x1f1   :  { %2398 = vmatpush1.bf16.msra.mxu0 %v4086_v4  ;;  %v4190_v4 = vld [vmem:[#allocation6 + $0x100] sm:$0xff]  }
 0x1f2   :  { %3662 = vmatpush3.bf16.msra.mxu1 %v4090_v5  ;;  %2399 = vmatprep.subr.bf16.mxu0 %v4093_v8  ;;  %v4191_v5 = vld [vmem:[#allocation6 + $0x148] sm:$0xff]  }
 0x1f3   :  { %3663 = vmatprep.subr.bf16.mxu1 %v4094_v9  ;;  %v4192_v8 = vld [vmem:[#allocation6 + $0x108] sm:$0xff]   ;;  %v4193_v9 = vld [vmem:[#allocation6 + $0x150] sm:$0xff]  }
 0x1f5   :  { %2400 = vmatpush1.bf16.msra.mxu0 %v4091_v10  ;;  %v4194_v10 = vld [vmem:[#allocation6 + $0x110] sm:$0xff]  }
 0x1f6   :  { %3664 = vmatpush3.bf16.msra.mxu1 %v4095_v11  ;;  %2401 = vmatprep.subr.bf16.mxu0 %v4098_v12  ;;  %v4195_v11 = vld [vmem:[#allocation6 + $0x158] sm:$0xff]  }
 0x1f7   :  { %3665 = vmatprep.subr.bf16.mxu1 %v4099_v15  ;;  %v4196_v12 = vld [vmem:[#allocation6 + $0x118] sm:$0xff]   ;;  %v4197_v15 = vld [vmem:[#allocation6 + $0x160] sm:$0xff]  }
 0x1f9   :  { %2402 = vmatpush1.bf16.msra.mxu0 %v4096_v17  ;;  %v4198_v17 = vld [vmem:[#allocation6 + $0x120] sm:$0xff]  }
 0x1fa   :  { %3666 = vmatpush3.bf16.msra.mxu1 %v4100_v19  ;;  %2412 = vmatprep.subr.bf16.mxu0 %v4103_v20  ;;  %v4200_v19 = vld [vmem:[#allocation6 + $0x128] sm:$0xff]   ;;  %v4501_v20 = vsub.s32 1, %v4460_v16 }
 0x1fb   :  { %3673 = vmatprep.subr.bf16.mxu1 %v4149_v21  ;;  %v4504_v21 = vsub.s32 5, %v4460_v16 }
 0x1fc   :  { %2404 = vmatmul.mubr.bf16.vlgmr.msra.gmra.mrb[12].mxu0 %v4474_v63  ;;  %v4155_v63 = vld [vmem:[#allocation6 + $0x58] sm:$0xff]  }
 0x1fd   :  { %2526 = vmatmul.mubr.bf16.vlgmr.msra.gmra.mrb[16].mxu1 %v4488_v14  ;;  %2413 = vmatpush1.bf16.msra.mxu0 %v4101_v22  ;;  %v995_v22 = vrot.slane %v4463_v18, %v4501_v20 }
 0x1fe   :  { %2444 = vmatprep.mubr.bf16.mxu0 %v4482_v13  ;;  %2414 = vmatprep.subr.bf16.mxu0 %v4106_v7  ;;  %v4156_v13 = vld [vmem:[#allocation6 + $0x18] sm:$0xff]   ;;  %v999_v7 = vrot.slane %v4463_v18, %v4504_v21 }
 0x1ff   :  { %3674 = vmatpush3.bf16.msra.mxu1 %v4150_v24  ;;  %v1007_v24 = vrot.slane %v4468_v23, %v4504_v21 }
 0x200   :  { %3675 = vmatprep.subr.bf16.mxu1 %v4151_v6  ;;  %v1030_v6 = vrot.slane %v995_v22, %v4501_v20  ;;  %v4187_v22 = vld [vmem:[#allocation6 + $0x1b0] sm:$0xff]  }
 0x201   :  { %2415 = vmatpush1.bf16.msra.mxu0 %v4104_v25  ;;  %v1034_v25 = vrot.slane %v999_v7, %v4501_v20 }
 0x202   :  { %2416 = vmatprep.subr.bf16.mxu0 %v4109_v26  ;;  %v1042_v26 = vrot.slane %v1007_v24, %v4501_v20 }
 0x203   :  { %3676 = vmatpush3.bf16.msra.mxu1 %v4152_v27 }
 0x204   :  { %3677 = vmatprep.subr.bf16.mxu1 %v4153_v28 }
 0x205   :  { %2417 = vmatpush1.bf16.msra.mxu0 %v4107_v29  ;;  %v4201_v29 = vld [vmem:[#allocation6 + $0x170] sm:$0xff]  }
 0x206   :  { %2418 = vmatprep.subr.bf16.mxu0 %v4112_v57 }
 0x207   :  { %3678 = vmatpush3.bf16.msra.mxu1 %v4154_v30 }
 0x208   :  { %3679 = vmatprep.subr.bf16.mxu1 %v4155_v63 }
 0x209   :  { %2419 = vmatpush1.bf16.msra.mxu0 %v4110_v31  ;;  %v4202_v31 = vld [vmem:[#allocation6 + $0x130] sm:$0xff]  }
 0x20a   :  { %2420 = vmatprep.subr.bf16.mxu0 %v4115_v32 }
 0x20b   :  { %3680 = vmatpush3.bf16.msra.mxu1 %v4156_v13 }
 0x20c   :  { %3681 = vmatprep.subr.bf16.mxu1 %v4157_v33 }
 0x20d   :  { %2421 = vmatpush1.bf16.msra.mxu0 %v4113_v34 }
 0x20e   :  { %2422 = vmatprep.subr.bf16.mxu0 %v4118_v35 }
 0x20f   :  { %3682 = vmatpush3.bf16.msra.mxu1 %v4158_v36 }
 0x210   :  { %3683 = vmatprep.subr.bf16.mxu1 %v4159_v37 }
 0x211   :  { %2423 = vmatpush1.bf16.msra.mxu0 %v4116_v38 }
 0x212   :  { %2424 = vmatprep.subr.bf16.mxu0 %v4121_v39  ;;  %v4203_v39 = vld [vmem:[#allocation6 + $0x178] sm:$0xff]  }
 0x213   :  { %3684 = vmatpush3.bf16.msra.mxu1 %v4160_v40  ;;  %v4204_v40 = vld [vmem:[#allocation6 + $0x138] sm:$0xff]  }
 0x214   :  { %3685 = vmatprep.subr.bf16.mxu1 %v4161_v41 }
 0x215   :  { %2425 = vmatpush1.bf16.msra.mxu0 %v4119_v42  ;;  %v4166_v42 = vld [vmem:[#allocation6 + $0x80] sm:$0xff]  }
 0x216   :  { %2426 = vmatprep.subr.bf16.mxu0 %v4124_v43 }
 0x217   :  { %3686 = vmatpush3.bf16.msra.mxu1 %v4162_v44  ;;  %v4167_v44 = vld [vmem:[#allocation6 + $0xc8] sm:$0xff]  }
 0x218   :  { %3687 = vmatprep.subr.bf16.mxu1 %v4163_v0 }
 0x219   :  { %2427 = vmatpush1.bf16.msra.mxu0 %v4122_v45  ;;  %v4344_v45 = vmov 0.0  }
 0x21a   :  { %2428 = vmatprep.subr.bf16.mxu0 %v4127_v46  ;;  %v4168_v46 = vld [vmem:[#allocation6 + $0x88] sm:$0xff]  }
 0x21b   :  { %3688 = vmatpush3.bf16.msra.mxu1 %v4164_v47  ;;  %v4169_v47 = vld [vmem:[#allocation6 + $0xd0] sm:$0xff]  }
 0x21c   :  { %3695 = vmatprep.subr.bf16.mxu1 %v4165_v48  ;;  %v4170_v48 = vld [vmem:[#allocation6 + $0x90] sm:$0xff]  }
 0x21d   :  { %2429 = vmatpush1.bf16.msra.mxu0 %v4125_v49  ;;  %v4171_v49 = vld [vmem:[#allocation6 + $0xd8] sm:$0xff]  }
 0x21e   :  { %2430 = vmatprep.subr.bf16.mxu0 %v4130_v50  ;;  %v4172_v50 = vld [vmem:[#allocation6 + $0x98] sm:$0xff]  }
 0x221   :  { %2431 = vmatpush1.bf16.msra.mxu0 %v4128_v51  ;;  %v4173_v51 = vld [vmem:[#allocation6 + $0xe0] sm:$0xff]  }
 0x222   :  { %2432 = vmatprep.subr.bf16.mxu0 %v4133_v52  ;;  %v4174_v52 = vld [vmem:[#allocation6 + $0xa0] sm:$0xff]  }
 0x225   :  { %2433 = vmatpush1.bf16.msra.mxu0 %v4131_v53  ;;  %v1003_v53 = vrot.slane %v4468_v23, %v4501_v20 }
 0x226   :  { %2434 = vmatprep.subr.bf16.mxu0 %v4136_v54  ;;  %v4175_v54 = vld [vmem:[#allocation6 + $0xe8] sm:$0xff]  }
 0x229   :  { %2435 = vmatpush1.bf16.msra.mxu0 %v4134_v55  ;;  %v4176_v55 = vld [vmem:[#allocation6 + $0xa8] sm:$0xff]  }
 0x22a   :  { %2436 = vmatprep.subr.bf16.mxu0 %v4139_v56  ;;  %v1038_v56 = vrot.slane %v1003_v53, %v4501_v20  ;;  %v4211_v53 = vld [vmem:[#allocation7 + $0x30] sm:$0xff]  }
 0x22d   :  { %2437 = vmatpush1.bf16.msra.mxu0 %v4137_v58  ;;  %v4177_v58 = vld [vmem:[#allocation6 + $0xf0] sm:$0xff]  }
 0x22e   :  { %2438 = vmatprep.subr.bf16.mxu0 %v4142_v59  ;;  %v4178_v59 = vld [vmem:[#allocation6 + $0xb0] sm:$0xff]  }
 0x231   :  { %2439 = vmatpush1.bf16.msra.mxu0 %v4140_v60 }
 0x232   :  { %2440 = vmatprep.subr.bf16.mxu0 %v4145_v61  ;;  %v4179_v61 = vld [vmem:[#allocation6 + $0xf8] sm:$0xff]  }
 0x235   :  { %2441 = vmatpush1.bf16.msra.mxu0 %v4143_v62 }
 0x236   :  { %2442 = vmatprep.subr.bf16.mxu0 %v4148_v1 }
 0x239   :  { %2443 = vmatpush1.bf16.msra.mxu0 %v4146_v2  ;;  %v4180_v2 = vld [vmem:[#allocation6 + $0xb8] sm:$0xff]  }
 0x23a   :  { %3717 = vmatprep.subr.bf16.mxu0 %v4189_v3 }
 0x23c   :  { %2445 = vmatmul.mubr.bf16.vlgmr.msra.gmra.mrb[12].mxu0 %v4488_v14  ;;  %v4199_v14 = vld [vmem:[#allocation6 + $0x168] sm:$0xff]  }
 0x23d   :  { %3718 = vmatpush3.bf16.msra.mxu0 %v4190_v4 }
 0x23e   :  { %3719 = vmatprep.subr.bf16.mxu0 %v4191_v5 }
 0x241   :  { %3720 = vmatpush3.bf16.msra.mxu0 %v4192_v8  ;;  %v4181_v8 = vld [vmem:[#allocation6 + $0x180] sm:$0xff]  }
 0x242   :  { %3721 = vmatprep.subr.bf16.mxu0 %v4193_v9 }
 0x245   :  { %3722 = vmatpush3.bf16.msra.mxu0 %v4194_v10  ;;  %v4182_v10 = vld [vmem:[#allocation6 + $0x188] sm:$0xff]  }
 0x246   :  { %3723 = vmatprep.subr.bf16.mxu0 %v4195_v11  ;;  %v4183_v11 = vld [vmem:[#allocation6 + $0x190] sm:$0xff]  }
 0x249   :  { %3724 = vmatpush3.bf16.msra.mxu0 %v4196_v12  ;;  %v4184_v12 = vld [vmem:[#allocation6 + $0x198] sm:$0xff]  }
 0x24a   :  { %3725 = vmatprep.subr.bf16.mxu0 %v4197_v15  ;;  %v4185_v15 = vld [vmem:[#allocation6 + $0x1a0] sm:$0xff]  }
 0x24d   :  { %3726 = vmatpush3.bf16.msra.mxu0 %v4198_v17  ;;  %v4186_v17 = vld [vmem:[#allocation6 + $0x1a8] sm:$0xff]  }
 0x24e   :  { %3727 = vmatprep.subr.bf16.mxu0 %v4199_v14  ;;  %v4213_v14 = vld [vmem:[#allocation9 + $0x18] sm:$0xff] }
 0x251   :  { %3728 = vmatpush3.bf16.msra.mxu0 %v4200_v19  ;;  %v1019_v19 = vrot.slane %v4213_v14, %v4501_v20 }
 0x252   :  { %3729 = vmatprep.subr.bf16.mxu0 %v4201_v29 }
 0x253   :  { %v1054_v7 = vrot.slane %v1019_v19, %v4501_v20 }
 0x255   :  { %3730 = vmatpush3.bf16.msra.mxu0 %v4202_v31  ;;  %v4214_v31 = vld [vmem:[#allocation9 + $0x10] sm:$0xff] }
 0x256   :  { %3731 = vmatprep.subr.bf16.mxu0 %v4203_v39 }
 0x259   :  { %3732 = vmatpush3.bf16.msra.mxu0 %v4204_v40 }
 0x25a   :  { %3777 = vmatprep.subr.bf16.mxu0 %v4344_v45 }
 0x28f   :  { %v2282_v27 = vpop.f32.mrb[8].mxu0  ;;  %v2364_v28 = vpop.f32.mrb[8].mxu1 }
 0x290   :  { %v3797_v57 = vadd.f32 %v2282_v27, %v1030_v6  ;;  %v2284_v30 = vpop.f32.mrb[9].mxu0  ;;  %v2366_v63 = vpop.f32.mrb[9].mxu1  ;;  %v3799_v60 = vadd.f32 %v2364_v28, %v1038_v56  ;;  %v4215_v56 = vld [vmem:[#allocation9] sm:$0xff] }
 0x291   :  { %v3798_v32 = vadd.f32 %v2284_v30, %v1034_v25  ;;  %v3800_v13 = vadd.f32 %v2366_v63, %v1042_v26  ;;  %v2286_v33 = vpop.f32.mrb[10].mxu0  ;;  %v2368_v18 = vpop.f32.mrb[10].mxu1  ;;  %v4188_v25 = vld [vmem:[#allocation6 + $0x1b8] sm:$0xff]  }
 0x292   :  { %v2533_v34 = vmax.f32 %v3797_v57, 0.0  ;;  %v2287_v35 = vpop.f32.mrb[11].mxu0  ;;  %v2369_v36 = vpop.f32.mrb[11].mxu1  ;;  %v2535_v3 = vmax.f32 %v3799_v60, 0.0 }
 0x293   :  { %v2534_v37 = vmax.f32 %v3798_v32, 0.0  ;;  %v2536_v38 = vmax.f32 %v3800_v13, 0.0  ;;  %v1011_v32 = vrot.slane %v4214_v31, %v4501_v20  ;;  %v1015_v13 = vrot.slane %v4214_v31, %v4504_v21  ;;  %v4205_v21 = vld [vmem:[#allocation7] sm:$0xff]  }
 0x294   :  { %v2540_v43 = vpack.c.bf16 %v2533_v34, %v2533_v34  ;;  %v2542_v9 = vpack.c.bf16 %v2535_v3, %v2535_v3 }
 0x295   :  { %v2541_v41 = vpack.c.bf16 %v2534_v37, %v2534_v37  ;;  %v2543_v0 = vpack.c.bf16 %v2536_v38, %v2536_v38  ;;  %v1046_v33 = vrot.slane %v1011_v32, %v4501_v20  ;;  %v1050_v18 = vrot.slane %v1015_v13, %v4501_v20  ;;  %v4207_v20 = vld [vmem:[#allocation7 + $0x10] sm:$0xff]  }
 0x297   :  { %3031 = vmatprep.mubr.bf16.mxu1 %v2541_v41 }
 0x298   :  { %3032 = vmatmul.mubr.bf16.vlgmr.msra.gmra.mrb[20].mxu1 %v2540_v43 }
 0x299   :  { %3696 = vmatpush3.bf16.msra.mxu1 %v4166_v42  ;;  %3071 = vmatprep.mubr.bf16.mxu1 %v2543_v0  ;;  %v4208_v0 = vld [vmem:[#allocation7 + $0x18] sm:$0xff]  }
 0x29a   :  { %3697 = vmatprep.subr.bf16.mxu1 %v4167_v44  ;;  %v4206_v44 = vld [vmem:[#allocation7 + $0x8] sm:$0xff]  }
 0x29d   :  { %3698 = vmatpush3.bf16.msra.mxu1 %v4168_v46  ;;  %v4209_v46 = vld [vmem:[#allocation7 + $0x20] sm:$0xff]  }
 0x29e   :  { %3699 = vmatprep.subr.bf16.mxu1 %v4169_v47 }
 0x2a1   :  { %3700 = vmatpush3.bf16.msra.mxu1 %v4170_v48  ;;  %v4210_v48 = vld [vmem:[#allocation7 + $0x28] sm:$0xff]  }
 0x2a2   :  { %3701 = vmatprep.subr.bf16.mxu1 %v4171_v49 }
 0x2a5   :  { %3702 = vmatpush3.bf16.msra.mxu1 %v4172_v50 }
 0x2a6   :  { %3703 = vmatprep.subr.bf16.mxu1 %v4173_v51 }
 0x2a9   :  { %3704 = vmatpush3.bf16.msra.mxu1 %v4174_v52 }
 0x2aa   :  { %3705 = vmatprep.subr.bf16.mxu1 %v4175_v54  ;;  %v4212_v54 = vld [vmem:[#allocation7 + $0x38] sm:$0xff]  }
 0x2ad   :  { %3706 = vmatpush3.bf16.msra.mxu1 %v4176_v55  ;;  %v2661_v55 = vsub.s32 2, %v4460_v16 }
 0x2ae   :  { %3707 = vmatprep.subr.bf16.mxu1 %v4177_v58 }
 0x2af   :  { %v2662_v58 = vrot.slane %v4215_v56, %v2661_v55 }
 0x2b0   :  { %v3645_v62 = vpop.f32.mrb[12].mxu1 }
 0x2b1   :  { %v3646_v1 = vpop.f32.mrb[13].mxu1  ;;  %3708 = vmatpush3.bf16.msra.mxu1 %v4178_v59 }
 0x2b2   :  { %v3647_v4 = vadd.f32 %v3646_v1, %v3645_v62  ;;  %v3648_v23 = vpop.f32.mrb[14].mxu1  ;;  %3709 = vmatprep.subr.bf16.mxu1 %v4179_v61 }
 0x2b3   :  { %v3649_v5 = vpop.f32.mrb[15].mxu1 }
 0x2b4   :  { %v2488_v26 = vadd.f32 %v3647_v4, %v1054_v7 }
 0x2b5   :  { %3710 = vmatpush3.bf16.msra.mxu1 %v4180_v2 }
 0x2b6   :  { %3757 = vmatprep.subr.bf16.mxu1 %v4344_v45 }
 0x2b8   :  { %3072 = vmatmul.mubr.bf16.vlgmr.msra.gmra.mrb[24].mxu1 %v2542_v9 }
 0x2b9   :  { %3758 = vmatpush3.bf16.msra.mxu1 %v4181_v8  ;;  %3773 = vmatprep.mubr.msk.bf16.mxu1 %vm4345_vm0, %v4344_v45 }
 0x2ba   :  { %3759 = vmatprep.subr.bf16.mxu1 %v4344_v45 }
 0x2bd   :  { %3760 = vmatpush3.bf16.msra.mxu1 %v4182_v10 }
 0x2be   :  { %3761 = vmatprep.subr.bf16.mxu1 %v4344_v45 }
 0x2c1   :  { %3762 = vmatpush3.bf16.msra.mxu1 %v4183_v11 }
 0x2c2   :  { %3763 = vmatprep.subr.bf16.mxu1 %v4344_v45 }
 0x2c5   :  { %3764 = vmatpush3.bf16.msra.mxu1 %v4184_v12 }
 0x2c6   :  { %3765 = vmatprep.subr.bf16.mxu1 %v4344_v45 }
 0x2c9   :  { %3766 = vmatpush3.bf16.msra.mxu1 %v4185_v15 }
 0x2ca   :  { %3767 = vmatprep.subr.bf16.mxu1 %v4344_v45 }
 0x2cd   :  { %3768 = vmatpush3.bf16.msra.mxu1 %v4186_v17 }
 0x2ce   :  { %3769 = vmatprep.subr.bf16.mxu1 %v4344_v45 }
 0x2d0   :  { %v3667_v24 = vpop.f32.mrb[16].mxu1 }
 0x2d1   :  { %v3668_v6 = vpop.f32.mrb[17].mxu1  ;;  %3770 = vmatpush3.bf16.msra.mxu1 %v4187_v22  ;;  %v3179_v22 = vsub.s32 3, %v4460_v16 }
 0x2d2   :  { %v3669_v27 = vadd.f32 %v3668_v6, %v3667_v24  ;;  %v3670_v28 = vpop.f32.mrb[18].mxu1  ;;  %3771 = vmatprep.subr.bf16.mxu1 %v4344_v45 }
 0x2d3   :  { %v3671_v29 = vpop.f32.mrb[19].mxu1  ;;  %v3180_v7 = vrot.slane %v4215_v56, %v3179_v22 }
 0x2d4   :  { %v2528_v57 = vadd.f32 %v3669_v27, %v2488_v26 }
 0x2d5   :  { %3772 = vmatpush3.bf16.msra.mxu1 %v4188_v25 }
 0x2d6   :  { %v2539_v30 = vmax.f32 %v2528_v57, 0.0 }
 0x2d8   :  { %v2546_v63 = vpack.c.bf16 %v2539_v30, %v2539_v30 }
 0x2da   :  { %3774 = vmatmul.mubr.bf16.vlgmr.msra.gmra.mrb[28].mxu1 %v2546_v63 }
 0x30f   :  { %v2446_v34 = vpop.f32.mrb[12].mxu0 }
 0x310   :  { %v3801_v35 = vadd.f32 %v2446_v34, %v1046_v33  ;;  %v2448_v36 = vpop.f32.mrb[13].mxu0 }
 0x311   :  { %v3802_v37 = vadd.f32 %v2448_v36, %v1050_v18  ;;  %v2450_v38 = vpop.f32.mrb[14].mxu0 }
 0x312   :  { %v2537_v39 = vmax.f32 %v3801_v35, 0.0  ;;  %v2451_v40 = vpop.f32.mrb[15].mxu0 }
 0x313   :  { %v2538_v41 = vmax.f32 %v3802_v37, 0.0 }
 0x314   :  { %v2544_v43 = vpack.c.bf16 %v2537_v39, %v2537_v39 }
 0x315   :  { %v2545_v42 = vpack.c.bf16 %v2538_v41, %v2538_v41 }
 0x317   :  { %3111 = vmatprep.mubr.bf16.mxu0 %v2545_v42 }
 0x318   :  { %3112 = vmatmul.mubr.bf16.vlgmr.msra.gmra.mrb[16].mxu0 %v2544_v43 }
 0x319   :  { %3793 = vmatprep.mubr.msk.bf16.mxu0 %vm4345_vm0, %v4344_v45  ;;  %3778 = vmatpush3.bf16.msra.mxu0 %v4205_v21 }
 0x31a   :  { %3779 = vmatprep.subr.bf16.mxu0 %v4344_v45 }
 0x31d   :  { %3780 = vmatpush3.bf16.msra.mxu0 %v4206_v44 }
 0x31e   :  { %3781 = vmatprep.subr.bf16.mxu0 %v4344_v45 }
 0x321   :  { %3782 = vmatpush3.bf16.msra.mxu0 %v4207_v20 }
 0x322   :  { %3783 = vmatprep.subr.bf16.mxu0 %v4344_v45 }
 0x325   :  { %3784 = vmatpush3.bf16.msra.mxu0 %v4208_v0 }
 0x326   :  { %3785 = vmatprep.subr.bf16.mxu0 %v4344_v45 }
 0x329   :  { %3786 = vmatpush3.bf16.msra.mxu0 %v4209_v46 }
 0x32a   :  { %3787 = vmatprep.subr.bf16.mxu0 %v4344_v45 }
 0x32d   :  { %3788 = vmatpush3.bf16.msra.mxu0 %v4210_v48 }
 0x32e   :  { %3789 = vmatprep.subr.bf16.mxu0 %v4344_v45 }
 0x331   :  { %3790 = vmatpush3.bf16.msra.mxu0 %v4211_v53 }
 0x332   :  { %3791 = vmatprep.subr.bf16.mxu0 %v4344_v45 }
 0x335   :  { %3792 = vmatpush3.bf16.msra.mxu0 %v4212_v54 }
 0x36b   :  { %v3689_v47 = vpop.f32.mrb[20].mxu1 }
 0x36c   :  { %v3690_v49 = vpop.f32.mrb[21].mxu1 }
 0x36d   :  { %v3691_v50 = vadd.f32 %v3690_v49, %v3689_v47  ;;  %v3692_v51 = vpop.f32.mrb[22].mxu1 }
 0x36e   :  { %v3693_v52 = vpop.f32.mrb[23].mxu1 }
 0x36f   :  { %v3034_v61 = vadd.f32 %v3691_v50, %v2662_v58 }
 0x38b   :  { %v3711_v59 = vpop.f32.mrb[24].mxu1 }
 0x38c   :  { %v3712_v60 = vpop.f32.mrb[25].mxu1 }
 0x38d   :  { %v3713_v62 = vadd.f32 %v3712_v60, %v3711_v59  ;;  %v3714_v1 = vpop.f32.mrb[26].mxu1 }
 0x38e   :  { %v3715_v2 = vpop.f32.mrb[27].mxu1 }
 0x38f   :  { %v3074_v3 = vadd.f32 %v3713_v62, %v3034_v61 }
 0x3ad   :  { %v3153_v4 = vpop.f32.mrb[28].mxu1 }
 0x3ae   :  { %v3775_v23 = vpop.f32.mrb[29].mxu1 }
 0x3af   :  { %v3156_v5 = vpop.f32.mrb[30].mxu1 }
 0x3b0   :  { %v3776_v8 = vpop.f32.mrb[31].mxu1 }
 0x3eb   :  { %v3733_v9 = vpop.f32.mrb[16].mxu0 }
 0x3ec   :  { %v3734_v10 = vpop.f32.mrb[17].mxu0 }
 0x3ed   :  { %v3735_v45 = vadd.f32 %v3734_v10, %v3733_v9  ;;  %v3736_v11 = vpop.f32.mrb[18].mxu0 }
 0x3ee   :  { %v3737_v12 = vpop.f32.mrb[19].mxu0 }
 0x3ef   :  { %v3114_v15 = vadd.f32 %v3735_v45, %v3074_v3 }
 0x3f1   :  { %v3154_v17 = vadd.f32 %v3153_v4, %v3114_v15 }
 0x3f3   :  { %v3159_v14 = vmax.f32 %v3154_v17, 0.0 }
 0x3f5   :  { %v3160_v19 = vpack.c.bf16 %v3159_v14, %v3159_v14 }
 0x3f7   :  { %3794 = vmatmul.mubr.bf16.vlgmr.msra.gmra.mrb[20].mxu0 %v3160_v19 }
 0x4ca   :  { %v3263_v24 = vpop.f32.mrb[20].mxu0 }
 0x4cb   :  { %v3264_v6 = vadd.f32 %v3263_v24, %v3180_v7  ;;  %v3795_v25 = vpop.f32.mrb[21].mxu0 }
 0x4cc   :  { %v3266_v26 = vpop.f32.mrb[22].mxu0 }
 0x4cd   :  { %3269 = vst [vmem:[%s4555_s6] sm:$0xff] %v3264_v6  ;;  %v3796_v27 = vpop.f32.mrb[23].mxu0 }
 0x4ce   :  { %3274 = vsyncpa [#allocation3], 1 }
 0x4cf   :  { %3275 = vsyncpa [#allocation5], 1 }
 0x4d0   :  { %3276 = vsyncpa [#allocation8], 1 }

</bundles_post_ra>
